<compile_context>
chip_gen: v7x
topology: tpu7x:2x2x1
jax: 0.10.0
libtpu: 0.0.40
codegen_flags: <defaults>
</compile_context>

<pallas_src>
import functools

import jax
import jax.numpy as jnp
from jax.experimental import pallas as pl
from jax.experimental.pallas import tpu as pltpu

_HALO_BLK = 8  # halo block rows (second-to-last block dim must be a multiple of 8)


def _sepconv_kernel(dw_ref, pw_ref, bias_ref, xa_ref, xb_ref, o_ref, *,
                    kh, kw, cin, cout, th, wo):
    # dw_ref  : (Cin*KH*KW,) SMEM  depthwise weights (flat, row-major c,i,j)
    # pw_ref  : (Cout*Cin,)  SMEM  pointwise weights (flat, row-major co,ci)
    # bias_ref: (Cout,)      SMEM  combined bias = pw_bias + pw @ dw_bias
    # xa_ref  : (1, Cin, TH, Wp)        main row block of the padded input
    # xb_ref  : (1, Cin, HALO_BLK, Wp)  rows just below it (first kh-1 = halo)
    # o_ref   : (1, Cout, TH, Wo)       output row tile
    #
    # Single load of the tile (+halo); all kh*kw shifted windows are value slices.
    x = jnp.concatenate([xa_ref[0], xb_ref[0]], axis=1).astype(jnp.float32)
    # x: (Cin, TH + HALO_BLK, Wp)

    # Depthwise conv: per-channel VPU FMA with scalar weights from SMEM.
    d = []
    for c in range(cin):
        acc = None
        for i in range(kh):
            for j in range(kw):
                w = dw_ref[c * kh * kw + i * kw + j]
                term = x[c, i:i + th, j:j + wo] * w
                acc = term if acc is None else acc + term
        d.append(acc)

    # Pointwise 1x1 conv as VPU broadcast-FMA: Cout accumulators of shape (TH, Wo).
    for co in range(cout):
        acc = d[0] * pw_ref[co * cin + 0] + bias_ref[co]
        for ci in range(1, cin):
            acc = acc + d[ci] * pw_ref[co * cin + ci]
        o_ref[0, co] = acc.astype(o_ref.dtype)


def _choose_row_tile(ho, cin, cout, wp, wo, *, budget_bytes, itemsize=4):
    """Largest multiple-of-8 row tile whose double-buffered blocks fit the budget."""
    max_th = max(8, -(-ho // 8) * 8)
    th = 8
    cand = 8
    while cand <= min(max_th, 512):
        foot = 2 * itemsize * (cin * cand * wp + cin * _HALO_BLK * wp + cout * cand * wo)
        if foot > budget_bytes:
            break
        th = cand
        cand += 8
    # Keep >= 2 row tiles when possible so both v7x TensorCores get work even at N=1.
    if ho > 8:
        while th > 8 and -(-ho // th) < 2:
            th -= 8
    return th


def seperable_conv2d(x, dw_weight, dw_bias, pw_weight, pw_bias,
                     *, stride=1, padding=1):
    """x: (N, Cin, H, W) NCHW.  dw_weight: (Cin, 1, KH, KW), pw_weight: (Cout, Cin, 1, 1)
    (PyTorch layouts).  Returns (N, Cout, Ho, Wo) NCHW."""
    assert stride == 1, "TODO(synk): stride > 1 not implemented (module default stride=1)"
    N, cin, H, W = x.shape
    cout = pw_weight.shape[0]
    KH, KW = dw_weight.shape[2], dw_weight.shape[3]
    assert KH - 1 <= _HALO_BLK, "kernel height > 9 not supported"

    Ho = H + 2 * padding - KH + 1
    Wo = W + 2 * padding - KW + 1
    Wp = W + 2 * padding

    # Row tile: VMEM-budgeted (conservative across v5e/v6e/v7x), multiple of 8.
    th = _choose_row_tile(Ho, cin, cout, Wp, Wo, budget_bytes=12 * 1024 * 1024)
    T = -(-Ho // th)          # number of row tiles
    Ho_pad = T * th

    # Pad input: conv zero-padding plus extra zero rows at the bottom so the
    # 8-row halo block of the last tile stays in bounds.
    Hp2 = Ho_pad + _HALO_BLK
    xp = jnp.zeros((N, cin, Hp2, Wp), x.dtype)
    xp = xp.at[:, :, padding:padding + H, padding:padding + W].set(x)

    # Weights -> flat SMEM operands; fold the depthwise bias into the pointwise bias.
    dw = dw_weight[:, 0, :, :].reshape(cin * KH * KW).astype(jnp.float32)
    pw2 = pw_weight[:, :, 0, 0].astype(jnp.float32)                     # (Cout, Cin)
    bias_comb = (pw_bias.astype(jnp.float32) + pw2 @ dw_bias.astype(jnp.float32))
    pw = pw2.reshape(cout * cin)

    kernel = functools.partial(_sepconv_kernel, kh=KH, kw=KW, cin=cin,
                               cout=cout, th=th, wo=Wo)

    smem_spec = pl.BlockSpec(memory_space=pltpu.MemorySpace.SMEM)
    halo_blocks = th // _HALO_BLK   # th is a multiple of 8

    out = pl.pallas_call(
        kernel,
        out_shape=jax.ShapeDtypeStruct((N, cout, Ho_pad, Wo), x.dtype),
        grid_spec=pltpu.PrefetchScalarGridSpec(
            num_scalar_prefetch=0,
            grid=(N, T),
            in_specs=[
                smem_spec,   # depthwise weights
                smem_spec,   # pointwise weights
                smem_spec,   # combined bias
                # Main TH-row block of the padded input.
                pl.BlockSpec((1, cin, th, Wp), lambda n, t: (n, 0, t, 0)),
                # 8-row halo block starting at the next tile boundary (same array).
                pl.BlockSpec((1, cin, _HALO_BLK, Wp),
                             lambda n, t: (n, 0, (t + 1) * halo_blocks, 0)),
            ],
            out_specs=pl.BlockSpec((1, cout, th, Wo), lambda n, t: (n, 0, t, 0)),
        ),
        compiler_params=pltpu.CompilerParams(
            dimension_semantics=("parallel", "parallel"),
            vmem_limit_bytes=32 * 1024 * 1024),
    )(dw, pw, bias_comb, xp, xp)

    return out[:, :, :Ho, :]


def _reference(x_nchw, dw_weight, dw_bias, pw_weight, pw_bias, *, padding=1):
    """Pure-JAX reference using lax.conv_general_dilated (matches PyTorch)."""
    cin = x_nchw.shape[1]
    dw_out = jax.lax.conv_general_dilated(
        x_nchw, dw_weight,
        window_strides=(1, 1), padding=[(padding, padding), (padding, padding)],
        dimension_numbers=("NCHW", "OIHW", "NCHW"),
        feature_group_count=cin,
    ) + dw_bias.reshape(1, cin, 1, 1)
    pw_out = jax.lax.conv_general_dilated(
        dw_out, pw_weight,
        window_strides=(1, 1), padding=[(0, 0), (0, 0)],
        dimension_numbers=("NCHW", "OIHW", "NCHW"),
    ) + pw_bias.reshape(1, -1, 1, 1)
    return pw_out


if __name__ == "__main__":
    # Small shapes consistent with the module: N=2, Cin=4, Cout=8, H=W=16, k=3.
    N, CIN, COUT, H, W, K = 2, 4, 8, 16, 16, 3

    key = jax.random.PRNGKey(0)
    kx, k1, k2, k3, k4 = jax.random.split(key, 5)

    x = jax.random.normal(kx, (N, CIN, H, W), dtype=jnp.float32)
    dw_weight = jax.random.normal(k1, (CIN, 1, K, K), dtype=jnp.float32) * 0.1
    dw_bias = jax.random.normal(k2, (CIN,), dtype=jnp.float32) * 0.1
    pw_weight = jax.random.normal(k3, (COUT, CIN, 1, 1), dtype=jnp.float32) * 0.1
    pw_bias = jax.random.normal(k4, (COUT,), dtype=jnp.float32) * 0.1

    out = seperable_conv2d(x, dw_weight, dw_bias, pw_weight, pw_bias, padding=1)
    out = jax.block_until_ready(out)

    ref = _reference(x, dw_weight, dw_bias, pw_weight, pw_bias, padding=1)
    assert out.shape == (N, COUT, H, W), out.shape
    assert jnp.allclose(out, ref, atol=1e-4, rtol=1e-4), \
        float(jnp.max(jnp.abs(out - ref)))

    print("KERNEL_OK")
</pallas_src>

<mosaic_0001>
module attributes {stable_mosaic.version = 11 : i64} {
  func.func @_sepconv_kernel(%arg0: i32, %arg1: i32, %arg2: memref<36xf32, #tpu.memory_space<smem>>, %arg3: memref<32xf32, #tpu.memory_space<smem>>, %arg4: memref<8xf32, #tpu.memory_space<smem>>, %arg5: memref<1x4x8x18xf32, #tpu.memory_space<vmem>>, %arg6: memref<1x4x8x18xf32, #tpu.memory_space<vmem>>, %arg7: memref<1x8x8x16xf32, #tpu.memory_space<vmem>>) attributes {dimension_semantics = [#tpu.dimension_semantics<parallel>, #tpu.dimension_semantics<parallel>], iteration_bounds = array<i64: 2, 2>, scalar_prefetch = 0 : i64, scratch_operands = 0 : i64, tpu.core_type = #tpu.core_type<tc>, window_params = [{transform_indices = @transform_0, window_bounds = array<i64: 36>}, {transform_indices = @transform_1, window_bounds = array<i64: 32>}, {transform_indices = @transform_2, window_bounds = array<i64: 8>}, {transform_indices = @transform_3, window_bounds = array<i64: 1, 4, 8, 18>}, {transform_indices = @transform_4, window_bounds = array<i64: 1, 4, 8, 18>}, {transform_indices = @transform_5, window_bounds = array<i64: 1, 8, 8, 16>}]} {
    %c0 = arith.constant 0 : index
    %c0_0 = arith.constant 0 : index
    %c0_1 = arith.constant 0 : index
    %c0_2 = arith.constant 0 : index
    %0 = vector.load %arg5[%c0, %c0_0, %c0_1, %c0_2] : memref<1x4x8x18xf32, #tpu.memory_space<vmem>>, vector<1x4x8x18xf32>
    %1 = vector.shape_cast %0 : vector<1x4x8x18xf32> to vector<4x8x18xf32>
    %c0_3 = arith.constant 0 : index
    %c0_4 = arith.constant 0 : index
    %c0_5 = arith.constant 0 : index
    %c0_6 = arith.constant 0 : index
    %2 = vector.load %arg6[%c0_3, %c0_4, %c0_5, %c0_6] : memref<1x4x8x18xf32, #tpu.memory_space<vmem>>, vector<1x4x8x18xf32>
    %3 = vector.shape_cast %2 : vector<1x4x8x18xf32> to vector<4x8x18xf32>
    %4 = tpu.concatenate %1, %3 in 1 : vector<4x8x18xf32>, vector<4x8x18xf32> -> vector<4x16x18xf32>
    %c0_7 = arith.constant 0 : index
    %5 = memref.load %arg2[%c0_7] : memref<36xf32, #tpu.memory_space<smem>>
    %6 = vector.extract_strided_slice %4 {offsets = [0, 0, 0], sizes = [1, 8, 16], strides = [1, 1, 1]} : vector<4x16x18xf32> to vector<1x8x16xf32>
    %7 = vector.shape_cast %6 : vector<1x8x16xf32> to vector<8x16xf32>
    %8 = vector.broadcast %5 : f32 to vector<8x16xf32>
    %9 = arith.mulf %7, %8 : vector<8x16xf32>
    %c1 = arith.constant 1 : index
    %10 = memref.load %arg2[%c1] : memref<36xf32, #tpu.memory_space<smem>>
    %11 = vector.extract_strided_slice %4 {offsets = [0, 0, 1], sizes = [1, 8, 16], strides = [1, 1, 1]} : vector<4x16x18xf32> to vector<1x8x16xf32>
    %12 = vector.shape_cast %11 : vector<1x8x16xf32> to vector<8x16xf32>
    %13 = vector.broadcast %10 : f32 to vector<8x16xf32>
    %14 = arith.mulf %12, %13 : vector<8x16xf32>
    %15 = arith.addf %9, %14 : vector<8x16xf32>
    %c2 = arith.constant 2 : index
    %16 = memref.load %arg2[%c2] : memref<36xf32, #tpu.memory_space<smem>>
    %17 = vector.extract_strided_slice %4 {offsets = [0, 0, 2], sizes = [1, 8, 16], strides = [1, 1, 1]} : vector<4x16x18xf32> to vector<1x8x16xf32>
    %18 = vector.shape_cast %17 : vector<1x8x16xf32> to vector<8x16xf32>
    %19 = vector.broadcast %16 : f32 to vector<8x16xf32>
    %20 = arith.mulf %18, %19 : vector<8x16xf32>
    %21 = arith.addf %15, %20 : vector<8x16xf32>
    %c3 = arith.constant 3 : index
    %22 = memref.load %arg2[%c3] : memref<36xf32, #tpu.memory_space<smem>>
    %23 = vector.extract_strided_slice %4 {offsets = [0, 1, 0], sizes = [1, 8, 16], strides = [1, 1, 1]} : vector<4x16x18xf32> to vector<1x8x16xf32>
    %24 = vector.shape_cast %23 : vector<1x8x16xf32> to vector<8x16xf32>
    %25 = vector.broadcast %22 : f32 to vector<8x16xf32>
    %26 = arith.mulf %24, %25 : vector<8x16xf32>
    %27 = arith.addf %21, %26 : vector<8x16xf32>
    %c4 = arith.constant 4 : index
    %28 = memref.load %arg2[%c4] : memref<36xf32, #tpu.memory_space<smem>>
    %29 = vector.extract_strided_slice %4 {offsets = [0, 1, 1], sizes = [1, 8, 16], strides = [1, 1, 1]} : vector<4x16x18xf32> to vector<1x8x16xf32>
    %30 = vector.shape_cast %29 : vector<1x8x16xf32> to vector<8x16xf32>
    %31 = vector.broadcast %28 : f32 to vector<8x16xf32>
    %32 = arith.mulf %30, %31 : vector<8x16xf32>
    %33 = arith.addf %27, %32 : vector<8x16xf32>
    %c5 = arith.constant 5 : index
    %34 = memref.load %arg2[%c5] : memref<36xf32, #tpu.memory_space<smem>>
    %35 = vector.extract_strided_slice %4 {offsets = [0, 1, 2], sizes = [1, 8, 16], strides = [1, 1, 1]} : vector<4x16x18xf32> to vector<1x8x16xf32>
    %36 = vector.shape_cast %35 : vector<1x8x16xf32> to vector<8x16xf32>
    %37 = vector.broadcast %34 : f32 to vector<8x16xf32>
    %38 = arith.mulf %36, %37 : vector<8x16xf32>
    %39 = arith.addf %33, %38 : vector<8x16xf32>
    %c6 = arith.constant 6 : index
    %40 = memref.load %arg2[%c6] : memref<36xf32, #tpu.memory_space<smem>>
    %41 = vector.extract_strided_slice %4 {offsets = [0, 2, 0], sizes = [1, 8, 16], strides = [1, 1, 1]} : vector<4x16x18xf32> to vector<1x8x16xf32>
    %42 = vector.shape_cast %41 : vector<1x8x16xf32> to vector<8x16xf32>
    %43 = vector.broadcast %40 : f32 to vector<8x16xf32>
    %44 = arith.mulf %42, %43 : vector<8x16xf32>
    %45 = arith.addf %39, %44 : vector<8x16xf32>
    %c7 = arith.constant 7 : index
    %46 = memref.load %arg2[%c7] : memref<36xf32, #tpu.memory_space<smem>>
    %47 = vector.extract_strided_slice %4 {offsets = [0, 2, 1], sizes = [1, 8, 16], strides = [1, 1, 1]} : vector<4x16x18xf32> to vector<1x8x16xf32>
    %48 = vector.shape_cast %47 : vector<1x8x16xf32> to vector<8x16xf32>
    %49 = vector.broadcast %46 : f32 to vector<8x16xf32>
    %50 = arith.mulf %48, %49 : vector<8x16xf32>
    %51 = arith.addf %45, %50 : vector<8x16xf32>
    %c8 = arith.constant 8 : index
    %52 = memref.load %arg2[%c8] : memref<36xf32, #tpu.memory_space<smem>>
    %53 = vector.extract_strided_slice %4 {offsets = [0, 2, 2], sizes = [1, 8, 16], strides = [1, 1, 1]} : vector<4x16x18xf32> to vector<1x8x16xf32>
    %54 = vector.shape_cast %53 : vector<1x8x16xf32> to vector<8x16xf32>
    %55 = vector.broadcast %52 : f32 to vector<8x16xf32>
    %56 = arith.mulf %54, %55 : vector<8x16xf32>
    %57 = arith.addf %51, %56 : vector<8x16xf32>
    %c9 = arith.constant 9 : index
    %58 = memref.load %arg2[%c9] : memref<36xf32, #tpu.memory_space<smem>>
    %59 = vector.extract_strided_slice %4 {offsets = [1, 0, 0], sizes = [1, 8, 16], strides = [1, 1, 1]} : vector<4x16x18xf32> to vector<1x8x16xf32>
    %60 = vector.shape_cast %59 : vector<1x8x16xf32> to vector<8x16xf32>
    %61 = vector.broadcast %58 : f32 to vector<8x16xf32>
    %62 = arith.mulf %60, %61 : vector<8x16xf32>
    %c10 = arith.constant 10 : index
    %63 = memref.load %arg2[%c10] : memref<36xf32, #tpu.memory_space<smem>>
    %64 = vector.extract_strided_slice %4 {offsets = [1, 0, 1], sizes = [1, 8, 16], strides = [1, 1, 1]} : vector<4x16x18xf32> to vector<1x8x16xf32>
    %65 = vector.shape_cast %64 : vector<1x8x16xf32> to vector<8x16xf32>
    %66 = vector.broadcast %63 : f32 to vector<8x16xf32>
    %67 = arith.mulf %65, %66 : vector<8x16xf32>
    %68 = arith.addf %62, %67 : vector<8x16xf32>
    %c11 = arith.constant 11 : index
    %69 = memref.load %arg2[%c11] : memref<36xf32, #tpu.memory_space<smem>>
    %70 = vector.extract_strided_slice %4 {offsets = [1, 0, 2], sizes = [1, 8, 16], strides = [1, 1, 1]} : vector<4x16x18xf32> to vector<1x8x16xf32>
    %71 = vector.shape_cast %70 : vector<1x8x16xf32> to vector<8x16xf32>
    %72 = vector.broadcast %69 : f32 to vector<8x16xf32>
    %73 = arith.mulf %71, %72 : vector<8x16xf32>
    %74 = arith.addf %68, %73 : vector<8x16xf32>
    %c12 = arith.constant 12 : index
    %75 = memref.load %arg2[%c12] : memref<36xf32, #tpu.memory_space<smem>>
    %76 = vector.extract_strided_slice %4 {offsets = [1, 1, 0], sizes = [1, 8, 16], strides = [1, 1, 1]} : vector<4x16x18xf32> to vector<1x8x16xf32>
    %77 = vector.shape_cast %76 : vector<1x8x16xf32> to vector<8x16xf32>
    %78 = vector.broadcast %75 : f32 to vector<8x16xf32>
    %79 = arith.mulf %77, %78 : vector<8x16xf32>
    %80 = arith.addf %74, %79 : vector<8x16xf32>
    %c13 = arith.constant 13 : index
    %81 = memref.load %arg2[%c13] : memref<36xf32, #tpu.memory_space<smem>>
    %82 = vector.extract_strided_slice %4 {offsets = [1, 1, 1], sizes = [1, 8, 16], strides = [1, 1, 1]} : vector<4x16x18xf32> to vector<1x8x16xf32>
    %83 = vector.shape_cast %82 : vector<1x8x16xf32> to vector<8x16xf32>
    %84 = vector.broadcast %81 : f32 to vector<8x16xf32>
    %85 = arith.mulf %83, %84 : vector<8x16xf32>
    %86 = arith.addf %80, %85 : vector<8x16xf32>
    %c14 = arith.constant 14 : index
    %87 = memref.load %arg2[%c14] : memref<36xf32, #tpu.memory_space<smem>>
    %88 = vector.extract_strided_slice %4 {offsets = [1, 1, 2], sizes = [1, 8, 16], strides = [1, 1, 1]} : vector<4x16x18xf32> to vector<1x8x16xf32>
    %89 = vector.shape_cast %88 : vector<1x8x16xf32> to vector<8x16xf32>
    %90 = vector.broadcast %87 : f32 to vector<8x16xf32>
    %91 = arith.mulf %89, %90 : vector<8x16xf32>
    %92 = arith.addf %86, %91 : vector<8x16xf32>
    %c15 = arith.constant 15 : index
    %93 = memref.load %arg2[%c15] : memref<36xf32, #tpu.memory_space<smem>>
    %94 = vector.extract_strided_slice %4 {offsets = [1, 2, 0], sizes = [1, 8, 16], strides = [1, 1, 1]} : vector<4x16x18xf32> to vector<1x8x16xf32>
    %95 = vector.shape_cast %94 : vector<1x8x16xf32> to vector<8x16xf32>
    %96 = vector.broadcast %93 : f32 to vector<8x16xf32>
    %97 = arith.mulf %95, %96 : vector<8x16xf32>
    %98 = arith.addf %92, %97 : vector<8x16xf32>
    %c16 = arith.constant 16 : index
    %99 = memref.load %arg2[%c16] : memref<36xf32, #tpu.memory_space<smem>>
    %100 = vector.extract_strided_slice %4 {offsets = [1, 2, 1], sizes = [1, 8, 16], strides = [1, 1, 1]} : vector<4x16x18xf32> to vector<1x8x16xf32>
    %101 = vector.shape_cast %100 : vector<1x8x16xf32> to vector<8x16xf32>
    %102 = vector.broadcast %99 : f32 to vector<8x16xf32>
    %103 = arith.mulf %101, %102 : vector<8x16xf32>
    %104 = arith.addf %98, %103 : vector<8x16xf32>
    %c17 = arith.constant 17 : index
    %105 = memref.load %arg2[%c17] : memref<36xf32, #tpu.memory_space<smem>>
    %106 = vector.extract_strided_slice %4 {offsets = [1, 2, 2], sizes = [1, 8, 16], strides = [1, 1, 1]} : vector<4x16x18xf32> to vector<1x8x16xf32>
    %107 = vector.shape_cast %106 : vector<1x8x16xf32> to vector<8x16xf32>
    %108 = vector.broadcast %105 : f32 to vector<8x16xf32>
    %109 = arith.mulf %107, %108 : vector<8x16xf32>
    %110 = arith.addf %104, %109 : vector<8x16xf32>
    %c18 = arith.constant 18 : index
    %111 = memref.load %arg2[%c18] : memref<36xf32, #tpu.memory_space<smem>>
    %112 = vector.extract_strided_slice %4 {offsets = [2, 0, 0], sizes = [1, 8, 16], strides = [1, 1, 1]} : vector<4x16x18xf32> to vector<1x8x16xf32>
    %113 = vector.shape_cast %112 : vector<1x8x16xf32> to vector<8x16xf32>
    %114 = vector.broadcast %111 : f32 to vector<8x16xf32>
    %115 = arith.mulf %113, %114 : vector<8x16xf32>
    %c19 = arith.constant 19 : index
    %116 = memref.load %arg2[%c19] : memref<36xf32, #tpu.memory_space<smem>>
    %117 = vector.extract_strided_slice %4 {offsets = [2, 0, 1], sizes = [1, 8, 16], strides = [1, 1, 1]} : vector<4x16x18xf32> to vector<1x8x16xf32>
    %118 = vector.shape_cast %117 : vector<1x8x16xf32> to vector<8x16xf32>
    %119 = vector.broadcast %116 : f32 to vector<8x16xf32>
    %120 = arith.mulf %118, %119 : vector<8x16xf32>
    %121 = arith.addf %115, %120 : vector<8x16xf32>
    %c20 = arith.constant 20 : index
    %122 = memref.load %arg2[%c20] : memref<36xf32, #tpu.memory_space<smem>>
    %123 = vector.extract_strided_slice %4 {offsets = [2, 0, 2], sizes = [1, 8, 16], strides = [1, 1, 1]} : vector<4x16x18xf32> to vector<1x8x16xf32>
    %124 = vector.shape_cast %123 : vector<1x8x16xf32> to vector<8x16xf32>
    %125 = vector.broadcast %122 : f32 to vector<8x16xf32>
    %126 = arith.mulf %124, %125 : vector<8x16xf32>
    %127 = arith.addf %121, %126 : vector<8x16xf32>
    %c21 = arith.constant 21 : index
    %128 = memref.load %arg2[%c21] : memref<36xf32, #tpu.memory_space<smem>>
    %129 = vector.extract_strided_slice %4 {offsets = [2, 1, 0], sizes = [1, 8, 16], strides = [1, 1, 1]} : vector<4x16x18xf32> to vector<1x8x16xf32>
    %130 = vector.shape_cast %129 : vector<1x8x16xf32> to vector<8x16xf32>
    %131 = vector.broadcast %128 : f32 to vector<8x16xf32>
    %132 = arith.mulf %130, %131 : vector<8x16xf32>
    %133 = arith.addf %127, %132 : vector<8x16xf32>
    %c22 = arith.constant 22 : index
    %134 = memref.load %arg2[%c22] : memref<36xf32, #tpu.memory_space<smem>>
    %135 = vector.extract_strided_slice %4 {offsets = [2, 1, 1], sizes = [1, 8, 16], strides = [1, 1, 1]} : vector<4x16x18xf32> to vector<1x8x16xf32>
    %136 = vector.shape_cast %135 : vector<1x8x16xf32> to vector<8x16xf32>
    %137 = vector.broadcast %134 : f32 to vector<8x16xf32>
    %138 = arith.mulf %136, %137 : vector<8x16xf32>
    %139 = arith.addf %133, %138 : vector<8x16xf32>
    %c23 = arith.constant 23 : index
    %140 = memref.load %arg2[%c23] : memref<36xf32, #tpu.memory_space<smem>>
    %141 = vector.extract_strided_slice %4 {offsets = [2, 1, 2], sizes = [1, 8, 16], strides = [1, 1, 1]} : vector<4x16x18xf32> to vector<1x8x16xf32>
    %142 = vector.shape_cast %141 : vector<1x8x16xf32> to vector<8x16xf32>
    %143 = vector.broadcast %140 : f32 to vector<8x16xf32>
    %144 = arith.mulf %142, %143 : vector<8x16xf32>
    %145 = arith.addf %139, %144 : vector<8x16xf32>
    %c24 = arith.constant 24 : index
    %146 = memref.load %arg2[%c24] : memref<36xf32, #tpu.memory_space<smem>>
    %147 = vector.extract_strided_slice %4 {offsets = [2, 2, 0], sizes = [1, 8, 16], strides = [1, 1, 1]} : vector<4x16x18xf32> to vector<1x8x16xf32>
    %148 = vector.shape_cast %147 : vector<1x8x16xf32> to vector<8x16xf32>
    %149 = vector.broadcast %146 : f32 to vector<8x16xf32>
    %150 = arith.mulf %148, %149 : vector<8x16xf32>
    %151 = arith.addf %145, %150 : vector<8x16xf32>
    %c25 = arith.constant 25 : index
    %152 = memref.load %arg2[%c25] : memref<36xf32, #tpu.memory_space<smem>>
    %153 = vector.extract_strided_slice %4 {offsets = [2, 2, 1], sizes = [1, 8, 16], strides = [1, 1, 1]} : vector<4x16x18xf32> to vector<1x8x16xf32>
    %154 = vector.shape_cast %153 : vector<1x8x16xf32> to vector<8x16xf32>
    %155 = vector.broadcast %152 : f32 to vector<8x16xf32>
    %156 = arith.mulf %154, %155 : vector<8x16xf32>
    %157 = arith.addf %151, %156 : vector<8x16xf32>
    %c26 = arith.constant 26 : index
    %158 = memref.load %arg2[%c26] : memref<36xf32, #tpu.memory_space<smem>>
    %159 = vector.extract_strided_slice %4 {offsets = [2, 2, 2], sizes = [1, 8, 16], strides = [1, 1, 1]} : vector<4x16x18xf32> to vector<1x8x16xf32>
    %160 = vector.shape_cast %159 : vector<1x8x16xf32> to vector<8x16xf32>
    %161 = vector.broadcast %158 : f32 to vector<8x16xf32>
    %162 = arith.mulf %160, %161 : vector<8x16xf32>
    %163 = arith.addf %157, %162 : vector<8x16xf32>
    %c27 = arith.constant 27 : index
    %164 = memref.load %arg2[%c27] : memref<36xf32, #tpu.memory_space<smem>>
    %165 = vector.extract_strided_slice %4 {offsets = [3, 0, 0], sizes = [1, 8, 16], strides = [1, 1, 1]} : vector<4x16x18xf32> to vector<1x8x16xf32>
    %166 = vector.shape_cast %165 : vector<1x8x16xf32> to vector<8x16xf32>
    %167 = vector.broadcast %164 : f32 to vector<8x16xf32>
    %168 = arith.mulf %166, %167 : vector<8x16xf32>
    %c28 = arith.constant 28 : index
    %169 = memref.load %arg2[%c28] : memref<36xf32, #tpu.memory_space<smem>>
    %170 = vector.extract_strided_slice %4 {offsets = [3, 0, 1], sizes = [1, 8, 16], strides = [1, 1, 1]} : vector<4x16x18xf32> to vector<1x8x16xf32>
    %171 = vector.shape_cast %170 : vector<1x8x16xf32> to vector<8x16xf32>
    %172 = vector.broadcast %169 : f32 to vector<8x16xf32>
    %173 = arith.mulf %171, %172 : vector<8x16xf32>
    %174 = arith.addf %168, %173 : vector<8x16xf32>
    %c29 = arith.constant 29 : index
    %175 = memref.load %arg2[%c29] : memref<36xf32, #tpu.memory_space<smem>>
    %176 = vector.extract_strided_slice %4 {offsets = [3, 0, 2], sizes = [1, 8, 16], strides = [1, 1, 1]} : vector<4x16x18xf32> to vector<1x8x16xf32>
    %177 = vector.shape_cast %176 : vector<1x8x16xf32> to vector<8x16xf32>
    %178 = vector.broadcast %175 : f32 to vector<8x16xf32>
    %179 = arith.mulf %177, %178 : vector<8x16xf32>
    %180 = arith.addf %174, %179 : vector<8x16xf32>
    %c30 = arith.constant 30 : index
    %181 = memref.load %arg2[%c30] : memref<36xf32, #tpu.memory_space<smem>>
    %182 = vector.extract_strided_slice %4 {offsets = [3, 1, 0], sizes = [1, 8, 16], strides = [1, 1, 1]} : vector<4x16x18xf32> to vector<1x8x16xf32>
    %183 = vector.shape_cast %182 : vector<1x8x16xf32> to vector<8x16xf32>
    %184 = vector.broadcast %181 : f32 to vector<8x16xf32>
    %185 = arith.mulf %183, %184 : vector<8x16xf32>
    %186 = arith.addf %180, %185 : vector<8x16xf32>
    %c31 = arith.constant 31 : index
    %187 = memref.load %arg2[%c31] : memref<36xf32, #tpu.memory_space<smem>>
    %188 = vector.extract_strided_slice %4 {offsets = [3, 1, 1], sizes = [1, 8, 16], strides = [1, 1, 1]} : vector<4x16x18xf32> to vector<1x8x16xf32>
    %189 = vector.shape_cast %188 : vector<1x8x16xf32> to vector<8x16xf32>
    %190 = vector.broadcast %187 : f32 to vector<8x16xf32>
    %191 = arith.mulf %189, %190 : vector<8x16xf32>
    %192 = arith.addf %186, %191 : vector<8x16xf32>
    %c32 = arith.constant 32 : index
    %193 = memref.load %arg2[%c32] : memref<36xf32, #tpu.memory_space<smem>>
    %194 = vector.extract_strided_slice %4 {offsets = [3, 1, 2], sizes = [1, 8, 16], strides = [1, 1, 1]} : vector<4x16x18xf32> to vector<1x8x16xf32>
    %195 = vector.shape_cast %194 : vector<1x8x16xf32> to vector<8x16xf32>
    %196 = vector.broadcast %193 : f32 to vector<8x16xf32>
    %197 = arith.mulf %195, %196 : vector<8x16xf32>
    %198 = arith.addf %192, %197 : vector<8x16xf32>
    %c33 = arith.constant 33 : index
    %199 = memref.load %arg2[%c33] : memref<36xf32, #tpu.memory_space<smem>>
    %200 = vector.extract_strided_slice %4 {offsets = [3, 2, 0], sizes = [1, 8, 16], strides = [1, 1, 1]} : vector<4x16x18xf32> to vector<1x8x16xf32>
    %201 = vector.shape_cast %200 : vector<1x8x16xf32> to vector<8x16xf32>
    %202 = vector.broadcast %199 : f32 to vector<8x16xf32>
    %203 = arith.mulf %201, %202 : vector<8x16xf32>
    %204 = arith.addf %198, %203 : vector<8x16xf32>
    %c34 = arith.constant 34 : index
    %205 = memref.load %arg2[%c34] : memref<36xf32, #tpu.memory_space<smem>>
    %206 = vector.extract_strided_slice %4 {offsets = [3, 2, 1], sizes = [1, 8, 16], strides = [1, 1, 1]} : vector<4x16x18xf32> to vector<1x8x16xf32>
    %207 = vector.shape_cast %206 : vector<1x8x16xf32> to vector<8x16xf32>
    %208 = vector.broadcast %205 : f32 to vector<8x16xf32>
    %209 = arith.mulf %207, %208 : vector<8x16xf32>
    %210 = arith.addf %204, %209 : vector<8x16xf32>
    %c35 = arith.constant 35 : index
    %211 = memref.load %arg2[%c35] : memref<36xf32, #tpu.memory_space<smem>>
    %212 = vector.extract_strided_slice %4 {offsets = [3, 2, 2], sizes = [1, 8, 16], strides = [1, 1, 1]} : vector<4x16x18xf32> to vector<1x8x16xf32>
    %213 = vector.shape_cast %212 : vector<1x8x16xf32> to vector<8x16xf32>
    %214 = vector.broadcast %211 : f32 to vector<8x16xf32>
    %215 = arith.mulf %213, %214 : vector<8x16xf32>
    %216 = arith.addf %210, %215 : vector<8x16xf32>
    %c0_8 = arith.constant 0 : index
    %217 = memref.load %arg3[%c0_8] : memref<32xf32, #tpu.memory_space<smem>>
    %218 = vector.broadcast %217 : f32 to vector<8x16xf32>
    %219 = arith.mulf %57, %218 : vector<8x16xf32>
    %c0_9 = arith.constant 0 : index
    %220 = memref.load %arg4[%c0_9] : memref<8xf32, #tpu.memory_space<smem>>
    %221 = vector.broadcast %220 : f32 to vector<8x16xf32>
    %222 = arith.addf %219, %221 : vector<8x16xf32>
    %c1_10 = arith.constant 1 : index
    %223 = memref.load %arg3[%c1_10] : memref<32xf32, #tpu.memory_space<smem>>
    %224 = vector.broadcast %223 : f32 to vector<8x16xf32>
    %225 = arith.mulf %110, %224 : vector<8x16xf32>
    %226 = arith.addf %222, %225 : vector<8x16xf32>
    %c2_11 = arith.constant 2 : index
    %227 = memref.load %arg3[%c2_11] : memref<32xf32, #tpu.memory_space<smem>>
    %228 = vector.broadcast %227 : f32 to vector<8x16xf32>
    %229 = arith.mulf %163, %228 : vector<8x16xf32>
    %230 = arith.addf %226, %229 : vector<8x16xf32>
    %c3_12 = arith.constant 3 : index
    %231 = memref.load %arg3[%c3_12] : memref<32xf32, #tpu.memory_space<smem>>
    %232 = vector.broadcast %231 : f32 to vector<8x16xf32>
    %233 = arith.mulf %216, %232 : vector<8x16xf32>
    %234 = arith.addf %230, %233 : vector<8x16xf32>
    %c0_13 = arith.constant 0 : index
    %c0_14 = arith.constant 0 : index
    %c0_15 = arith.constant 0 : index
    %c0_16 = arith.constant 0 : index
    %235 = vector.load %arg7[%c0_13, %c0_14, %c0_15, %c0_16] : memref<1x8x8x16xf32, #tpu.memory_space<vmem>>, vector<1x1x8x16xf32>
    %236 = vector.shape_cast %235 : vector<1x1x8x16xf32> to vector<8x16xf32>
    %237 = vector.shape_cast %234 : vector<8x16xf32> to vector<1x1x8x16xf32>
    tpu.vector_store %arg7[%c0_13, %c0_14, %c0_15, %c0_16], %237 {strides = array<i32>} : memref<1x8x8x16xf32, #tpu.memory_space<vmem>>, vector<1x1x8x16xf32>,
    %c4_17 = arith.constant 4 : index
    %238 = memref.load %arg3[%c4_17] : memref<32xf32, #tpu.memory_space<smem>>
    %239 = vector.broadcast %238 : f32 to vector<8x16xf32>
    %240 = arith.mulf %57, %239 : vector<8x16xf32>
    %c1_18 = arith.constant 1 : index
    %241 = memref.load %arg4[%c1_18] : memref<8xf32, #tpu.memory_space<smem>>
    %242 = vector.broadcast %241 : f32 to vector<8x16xf32>
    %243 = arith.addf %240, %242 : vector<8x16xf32>
    %c5_19 = arith.constant 5 : index
    %244 = memref.load %arg3[%c5_19] : memref<32xf32, #tpu.memory_space<smem>>
    %245 = vector.broadcast %244 : f32 to vector<8x16xf32>
    %246 = arith.mulf %110, %245 : vector<8x16xf32>
    %247 = arith.addf %243, %246 : vector<8x16xf32>
    %c6_20 = arith.constant 6 : index
    %248 = memref.load %arg3[%c6_20] : memref<32xf32, #tpu.memory_space<smem>>
    %249 = vector.broadcast %248 : f32 to vector<8x16xf32>
    %250 = arith.mulf %163, %249 : vector<8x16xf32>
    %251 = arith.addf %247, %250 : vector<8x16xf32>
    %c7_21 = arith.constant 7 : index
    %252 = memref.load %arg3[%c7_21] : memref<32xf32, #tpu.memory_space<smem>>
    %253 = vector.broadcast %252 : f32 to vector<8x16xf32>
    %254 = arith.mulf %216, %253 : vector<8x16xf32>
    %255 = arith.addf %251, %254 : vector<8x16xf32>
    %c0_22 = arith.constant 0 : index
    %c1_23 = arith.constant 1 : index
    %c0_24 = arith.constant 0 : index
    %c0_25 = arith.constant 0 : index
    %256 = vector.load %arg7[%c0_22, %c1_23, %c0_24, %c0_25] : memref<1x8x8x16xf32, #tpu.memory_space<vmem>>, vector<1x1x8x16xf32>
    %257 = vector.shape_cast %256 : vector<1x1x8x16xf32> to vector<8x16xf32>
    %258 = vector.shape_cast %255 : vector<8x16xf32> to vector<1x1x8x16xf32>
    tpu.vector_store %arg7[%c0_22, %c1_23, %c0_24, %c0_25], %258 {strides = array<i32>} : memref<1x8x8x16xf32, #tpu.memory_space<vmem>>, vector<1x1x8x16xf32>,
    %c8_26 = arith.constant 8 : index
    %259 = memref.load %arg3[%c8_26] : memref<32xf32, #tpu.memory_space<smem>>
    %260 = vector.broadcast %259 : f32 to vector<8x16xf32>
    %261 = arith.mulf %57, %260 : vector<8x16xf32>
    %c2_27 = arith.constant 2 : index
    %262 = memref.load %arg4[%c2_27] : memref<8xf32, #tpu.memory_space<smem>>
    %263 = vector.broadcast %262 : f32 to vector<8x16xf32>
    %264 = arith.addf %261, %263 : vector<8x16xf32>
    %c9_28 = arith.constant 9 : index
    %265 = memref.load %arg3[%c9_28] : memref<32xf32, #tpu.memory_space<smem>>
    %266 = vector.broadcast %265 : f32 to vector<8x16xf32>
    %267 = arith.mulf %110, %266 : vector<8x16xf32>
    %268 = arith.addf %264, %267 : vector<8x16xf32>
    %c10_29 = arith.constant 10 : index
    %269 = memref.load %arg3[%c10_29] : memref<32xf32, #tpu.memory_space<smem>>
    %270 = vector.broadcast %269 : f32 to vector<8x16xf32>
    %271 = arith.mulf %163, %270 : vector<8x16xf32>
    %272 = arith.addf %268, %271 : vector<8x16xf32>
    %c11_30 = arith.constant 11 : index
    %273 = memref.load %arg3[%c11_30] : memref<32xf32, #tpu.memory_space<smem>>
    %274 = vector.broadcast %273 : f32 to vector<8x16xf32>
    %275 = arith.mulf %216, %274 : vector<8x16xf32>
    %276 = arith.addf %272, %275 : vector<8x16xf32>
    %c0_31 = arith.constant 0 : index
    %c2_32 = arith.constant 2 : index
    %c0_33 = arith.constant 0 : index
    %c0_34 = arith.constant 0 : index
    %277 = vector.load %arg7[%c0_31, %c2_32, %c0_33, %c0_34] : memref<1x8x8x16xf32, #tpu.memory_space<vmem>>, vector<1x1x8x16xf32>
    %278 = vector.shape_cast %277 : vector<1x1x8x16xf32> to vector<8x16xf32>
    %279 = vector.shape_cast %276 : vector<8x16xf32> to vector<1x1x8x16xf32>
    tpu.vector_store %arg7[%c0_31, %c2_32, %c0_33, %c0_34], %279 {strides = array<i32>} : memref<1x8x8x16xf32, #tpu.memory_space<vmem>>, vector<1x1x8x16xf32>,
    %c12_35 = arith.constant 12 : index
    %280 = memref.load %arg3[%c12_35] : memref<32xf32, #tpu.memory_space<smem>>
    %281 = vector.broadcast %280 : f32 to vector<8x16xf32>
    %282 = arith.mulf %57, %281 : vector<8x16xf32>
    %c3_36 = arith.constant 3 : index
    %283 = memref.load %arg4[%c3_36] : memref<8xf32, #tpu.memory_space<smem>>
    %284 = vector.broadcast %283 : f32 to vector<8x16xf32>
    %285 = arith.addf %282, %284 : vector<8x16xf32>
    %c13_37 = arith.constant 13 : index
    %286 = memref.load %arg3[%c13_37] : memref<32xf32, #tpu.memory_space<smem>>
    %287 = vector.broadcast %286 : f32 to vector<8x16xf32>
    %288 = arith.mulf %110, %287 : vector<8x16xf32>
    %289 = arith.addf %285, %288 : vector<8x16xf32>
    %c14_38 = arith.constant 14 : index
    %290 = memref.load %arg3[%c14_38] : memref<32xf32, #tpu.memory_space<smem>>
    %291 = vector.broadcast %290 : f32 to vector<8x16xf32>
    %292 = arith.mulf %163, %291 : vector<8x16xf32>
    %293 = arith.addf %289, %292 : vector<8x16xf32>
    %c15_39 = arith.constant 15 : index
    %294 = memref.load %arg3[%c15_39] : memref<32xf32, #tpu.memory_space<smem>>
    %295 = vector.broadcast %294 : f32 to vector<8x16xf32>
    %296 = arith.mulf %216, %295 : vector<8x16xf32>
    %297 = arith.addf %293, %296 : vector<8x16xf32>
    %c0_40 = arith.constant 0 : index
    %c3_41 = arith.constant 3 : index
    %c0_42 = arith.constant 0 : index
    %c0_43 = arith.constant 0 : index
    %298 = vector.load %arg7[%c0_40, %c3_41, %c0_42, %c0_43] : memref<1x8x8x16xf32, #tpu.memory_space<vmem>>, vector<1x1x8x16xf32>
    %299 = vector.shape_cast %298 : vector<1x1x8x16xf32> to vector<8x16xf32>
    %300 = vector.shape_cast %297 : vector<8x16xf32> to vector<1x1x8x16xf32>
    tpu.vector_store %arg7[%c0_40, %c3_41, %c0_42, %c0_43], %300 {strides = array<i32>} : memref<1x8x8x16xf32, #tpu.memory_space<vmem>>, vector<1x1x8x16xf32>,
    %c16_44 = arith.constant 16 : index
    %301 = memref.load %arg3[%c16_44] : memref<32xf32, #tpu.memory_space<smem>>
    %302 = vector.broadcast %301 : f32 to vector<8x16xf32>
    %303 = arith.mulf %57, %302 : vector<8x16xf32>
    %c4_45 = arith.constant 4 : index
    %304 = memref.load %arg4[%c4_45] : memref<8xf32, #tpu.memory_space<smem>>
    %305 = vector.broadcast %304 : f32 to vector<8x16xf32>
    %306 = arith.addf %303, %305 : vector<8x16xf32>
    %c17_46 = arith.constant 17 : index
    %307 = memref.load %arg3[%c17_46] : memref<32xf32, #tpu.memory_space<smem>>
    %308 = vector.broadcast %307 : f32 to vector<8x16xf32>
    %309 = arith.mulf %110, %308 : vector<8x16xf32>
    %310 = arith.addf %306, %309 : vector<8x16xf32>
    %c18_47 = arith.constant 18 : index
    %311 = memref.load %arg3[%c18_47] : memref<32xf32, #tpu.memory_space<smem>>
    %312 = vector.broadcast %311 : f32 to vector<8x16xf32>
    %313 = arith.mulf %163, %312 : vector<8x16xf32>
    %314 = arith.addf %310, %313 : vector<8x16xf32>
    %c19_48 = arith.constant 19 : index
    %315 = memref.load %arg3[%c19_48] : memref<32xf32, #tpu.memory_space<smem>>
    %316 = vector.broadcast %315 : f32 to vector<8x16xf32>
    %317 = arith.mulf %216, %316 : vector<8x16xf32>
    %318 = arith.addf %314, %317 : vector<8x16xf32>
    %c0_49 = arith.constant 0 : index
    %c4_50 = arith.constant 4 : index
    %c0_51 = arith.constant 0 : index
    %c0_52 = arith.constant 0 : index
    %319 = vector.load %arg7[%c0_49, %c4_50, %c0_51, %c0_52] : memref<1x8x8x16xf32, #tpu.memory_space<vmem>>, vector<1x1x8x16xf32>
    %320 = vector.shape_cast %319 : vector<1x1x8x16xf32> to vector<8x16xf32>
    %321 = vector.shape_cast %318 : vector<8x16xf32> to vector<1x1x8x16xf32>
    tpu.vector_store %arg7[%c0_49, %c4_50, %c0_51, %c0_52], %321 {strides = array<i32>} : memref<1x8x8x16xf32, #tpu.memory_space<vmem>>, vector<1x1x8x16xf32>,
    %c20_53 = arith.constant 20 : index
    %322 = memref.load %arg3[%c20_53] : memref<32xf32, #tpu.memory_space<smem>>
    %323 = vector.broadcast %322 : f32 to vector<8x16xf32>
    %324 = arith.mulf %57, %323 : vector<8x16xf32>
    %c5_54 = arith.constant 5 : index
    %325 = memref.load %arg4[%c5_54] : memref<8xf32, #tpu.memory_space<smem>>
    %326 = vector.broadcast %325 : f32 to vector<8x16xf32>
    %327 = arith.addf %324, %326 : vector<8x16xf32>
    %c21_55 = arith.constant 21 : index
    %328 = memref.load %arg3[%c21_55] : memref<32xf32, #tpu.memory_space<smem>>
    %329 = vector.broadcast %328 : f32 to vector<8x16xf32>
    %330 = arith.mulf %110, %329 : vector<8x16xf32>
    %331 = arith.addf %327, %330 : vector<8x16xf32>
    %c22_56 = arith.constant 22 : index
    %332 = memref.load %arg3[%c22_56] : memref<32xf32, #tpu.memory_space<smem>>
    %333 = vector.broadcast %332 : f32 to vector<8x16xf32>
    %334 = arith.mulf %163, %333 : vector<8x16xf32>
    %335 = arith.addf %331, %334 : vector<8x16xf32>
    %c23_57 = arith.constant 23 : index
    %336 = memref.load %arg3[%c23_57] : memref<32xf32, #tpu.memory_space<smem>>
    %337 = vector.broadcast %336 : f32 to vector<8x16xf32>
    %338 = arith.mulf %216, %337 : vector<8x16xf32>
    %339 = arith.addf %335, %338 : vector<8x16xf32>
    %c0_58 = arith.constant 0 : index
    %c5_59 = arith.constant 5 : index
    %c0_60 = arith.constant 0 : index
    %c0_61 = arith.constant 0 : index
    %340 = vector.load %arg7[%c0_58, %c5_59, %c0_60, %c0_61] : memref<1x8x8x16xf32, #tpu.memory_space<vmem>>, vector<1x1x8x16xf32>
    %341 = vector.shape_cast %340 : vector<1x1x8x16xf32> to vector<8x16xf32>
    %342 = vector.shape_cast %339 : vector<8x16xf32> to vector<1x1x8x16xf32>
    tpu.vector_store %arg7[%c0_58, %c5_59, %c0_60, %c0_61], %342 {strides = array<i32>} : memref<1x8x8x16xf32, #tpu.memory_space<vmem>>, vector<1x1x8x16xf32>,
    %c24_62 = arith.constant 24 : index
    %343 = memref.load %arg3[%c24_62] : memref<32xf32, #tpu.memory_space<smem>>
    %344 = vector.broadcast %343 : f32 to vector<8x16xf32>
    %345 = arith.mulf %57, %344 : vector<8x16xf32>
    %c6_63 = arith.constant 6 : index
    %346 = memref.load %arg4[%c6_63] : memref<8xf32, #tpu.memory_space<smem>>
    %347 = vector.broadcast %346 : f32 to vector<8x16xf32>
    %348 = arith.addf %345, %347 : vector<8x16xf32>
    %c25_64 = arith.constant 25 : index
    %349 = memref.load %arg3[%c25_64] : memref<32xf32, #tpu.memory_space<smem>>
    %350 = vector.broadcast %349 : f32 to vector<8x16xf32>
    %351 = arith.mulf %110, %350 : vector<8x16xf32>
    %352 = arith.addf %348, %351 : vector<8x16xf32>
    %c26_65 = arith.constant 26 : index
    %353 = memref.load %arg3[%c26_65] : memref<32xf32, #tpu.memory_space<smem>>
    %354 = vector.broadcast %353 : f32 to vector<8x16xf32>
    %355 = arith.mulf %163, %354 : vector<8x16xf32>
    %356 = arith.addf %352, %355 : vector<8x16xf32>
    %c27_66 = arith.constant 27 : index
    %357 = memref.load %arg3[%c27_66] : memref<32xf32, #tpu.memory_space<smem>>
    %358 = vector.broadcast %357 : f32 to vector<8x16xf32>
    %359 = arith.mulf %216, %358 : vector<8x16xf32>
    %360 = arith.addf %356, %359 : vector<8x16xf32>
    %c0_67 = arith.constant 0 : index
    %c6_68 = arith.constant 6 : index
    %c0_69 = arith.constant 0 : index
    %c0_70 = arith.constant 0 : index
    %361 = vector.load %arg7[%c0_67, %c6_68, %c0_69, %c0_70] : memref<1x8x8x16xf32, #tpu.memory_space<vmem>>, vector<1x1x8x16xf32>
    %362 = vector.shape_cast %361 : vector<1x1x8x16xf32> to vector<8x16xf32>
    %363 = vector.shape_cast %360 : vector<8x16xf32> to vector<1x1x8x16xf32>
    tpu.vector_store %arg7[%c0_67, %c6_68, %c0_69, %c0_70], %363 {strides = array<i32>} : memref<1x8x8x16xf32, #tpu.memory_space<vmem>>, vector<1x1x8x16xf32>,
    %c28_71 = arith.constant 28 : index
    %364 = memref.load %arg3[%c28_71] : memref<32xf32, #tpu.memory_space<smem>>
    %365 = vector.broadcast %364 : f32 to vector<8x16xf32>
    %366 = arith.mulf %57, %365 : vector<8x16xf32>
    %c7_72 = arith.constant 7 : index
    %367 = memref.load %arg4[%c7_72] : memref<8xf32, #tpu.memory_space<smem>>
    %368 = vector.broadcast %367 : f32 to vector<8x16xf32>
    %369 = arith.addf %366, %368 : vector<8x16xf32>
    %c29_73 = arith.constant 29 : index
    %370 = memref.load %arg3[%c29_73] : memref<32xf32, #tpu.memory_space<smem>>
    %371 = vector.broadcast %370 : f32 to vector<8x16xf32>
    %372 = arith.mulf %110, %371 : vector<8x16xf32>
    %373 = arith.addf %369, %372 : vector<8x16xf32>
    %c30_74 = arith.constant 30 : index
    %374 = memref.load %arg3[%c30_74] : memref<32xf32, #tpu.memory_space<smem>>
    %375 = vector.broadcast %374 : f32 to vector<8x16xf32>
    %376 = arith.mulf %163, %375 : vector<8x16xf32>
    %377 = arith.addf %373, %376 : vector<8x16xf32>
    %c31_75 = arith.constant 31 : index
    %378 = memref.load %arg3[%c31_75] : memref<32xf32, #tpu.memory_space<smem>>
    %379 = vector.broadcast %378 : f32 to vector<8x16xf32>
    %380 = arith.mulf %216, %379 : vector<8x16xf32>
    %381 = arith.addf %377, %380 : vector<8x16xf32>
    %c0_76 = arith.constant 0 : index
    %c7_77 = arith.constant 7 : index
    %c0_78 = arith.constant 0 : index
    %c0_79 = arith.constant 0 : index
    %382 = vector.load %arg7[%c0_76, %c7_77, %c0_78, %c0_79] : memref<1x8x8x16xf32, #tpu.memory_space<vmem>>, vector<1x1x8x16xf32>
    %383 = vector.shape_cast %382 : vector<1x1x8x16xf32> to vector<8x16xf32>
    %384 = vector.shape_cast %381 : vector<8x16xf32> to vector<1x1x8x16xf32>
    tpu.vector_store %arg7[%c0_76, %c7_77, %c0_78, %c0_79], %384 {strides = array<i32>} : memref<1x8x8x16xf32, #tpu.memory_space<vmem>>, vector<1x1x8x16xf32>,
    return
  }
  func.func @transform_0(%arg0: i32, %arg1: i32) -> i32 {
    %c0_i32 = arith.constant 0 : i32
    %c0_i32_0 = arith.constant 0 : i32
    return %c0_i32 : i32
  }
  func.func @transform_1(%arg0: i32, %arg1: i32) -> i32 {
    %c0_i32 = arith.constant 0 : i32
    %c0_i32_0 = arith.constant 0 : i32
    return %c0_i32 : i32
  }
  func.func @transform_2(%arg0: i32, %arg1: i32) -> i32 {
    %c0_i32 = arith.constant 0 : i32
    %c0_i32_0 = arith.constant 0 : i32
    return %c0_i32 : i32
  }
  func.func @transform_3(%arg0: i32, %arg1: i32) -> (i32, i32, i32, i32) {
    %c0_i32 = arith.constant 0 : i32
    %c0_i32_0 = arith.constant 0 : i32
    %c0_i32_1 = arith.constant 0 : i32
    return %arg0, %c0_i32, %arg1, %c0_i32_0 : i32, i32, i32, i32
  }
  func.func @transform_4(%arg0: i32, %arg1: i32) -> (i32, i32, i32, i32) {
    %c1_i32 = arith.constant 1 : i32
    %0 = arith.addi %arg1, %c1_i32 : i32
    %c1_i32_0 = arith.constant 1 : i32
    %1 = arith.muli %0, %c1_i32_0 : i32
    %c0_i32 = arith.constant 0 : i32
    %c0_i32_1 = arith.constant 0 : i32
    %c0_i32_2 = arith.constant 0 : i32
    return %arg0, %c0_i32, %1, %c0_i32_1 : i32, i32, i32, i32
  }
  func.func @transform_5(%arg0: i32, %arg1: i32) -> (i32, i32, i32, i32) {
    %c0_i32 = arith.constant 0 : i32
    %c0_i32_0 = arith.constant 0 : i32
    %c0_i32_1 = arith.constant 0 : i32
    return %arg0, %c0_i32, %arg1, %c0_i32_0 : i32, i32, i32, i32
  }
}

</mosaic_0001>

<bundles_post_ra>
// kernel: tpu_custom_call.1
= control target key start
LH: loop header
LB: loop body
LE: loop exit
PB: predicated region body
PF: predicated region fallthrough
CT: control target
= control target key end

     0   :  { %s2149_s0 = inlined_call_operand.vmem [shape: f32[36], index: 0, kind: input, shape index: {}]   ;;  %s2150_s1 = inlined_call_operand.vmem [shape: f32[32], index: 1, kind: input, shape index: {}]   ;;  %s2151_s2 = inlined_call_operand.vmem [shape: f32[8], index: 2, kind: input, shape index: {}]   ;;  %s2152_s3 = inlined_call_operand.vmem [shape: f32[2,4,24,18], index: 3, kind: input, shape index: {}]   ;;  %s2153_s4 = inlined_call_operand.vmem [shape: f32[2,4,24,18], index: 4, kind: input, shape index: {}]   ;;  %s2154_s5 = inlined_call_operand.hbm [shape: f32[2,8,16,16], index: 5, kind: output, shape index: {}]  }
   0x1   :  { %2167 = sst [smem:[#allocation24_spill]] %s2149_s0 }
   0x2   :  { %2168 = sst [smem:[#allocation25_spill]] %s2150_s1 }
   0x3   :  { %2169 = sst [smem:[#allocation26_spill]] %s2151_s2 }
   0x4   :  { %2170 = sst [smem:[#allocation27_spill]] %s2152_s3 }
   0x5   :  { %2171 = sst [smem:[#allocation28_spill]] %s2153_s4 }
   0x6   :  { %10 = vsyncpa [#allocation4], 0 }
   0x7   :  { %11 = vsyncpa [#allocation6], 0 }
   0x8   :  { %12 = vsyncpa [#allocation3], 0 }
   0x9   :  { %14 = vsyncpa [#allocation3 + $0x1], 0  ;;  %s1527_s18 = smov 0   ;;  %s1529_s19 = smov 0  }
   0xa   :  { %s1531_s20 = smov 0   ;;  %s1533_s21 = smov 0  }
   0xb   :  { %s1535_s22 = smov 0   ;;  %s1537_s23 = smov 0  }
   0xc   :  { %s1539_s24 = smov 0   ;;  %s1541_s25 = smov 0  }
   0xd   :  { %s1543_s26 = smov 0   ;;  %s1545_s27 = smov 0  }
   0xe LB: > { %2172 = sst [smem:[#allocation14_spill]] %s1458_s20  ;;  %s1092_s28 = sadd.s32 4294967295, %s1486_s27   ;;  %s1486_s27 = sphi %s1545_s27, %s20_s27   ;;  %s1482_s26 = sphi %s1543_s26, %s2209_s26   ;;  %s1478_s25 = sphi %s1541_s25, %s2208_s25   ;;  %s1474_s24 = sphi %s1539_s24, %s2207_s24   ;;  %s1470_s23 = sphi %s1537_s23, %s2206_s23   ;;  %s1466_s22 = sphi %s1535_s22, %s2205_s22   ;;  %s1462_s21 = sphi %s1533_s21, %s2204_s21   ;;  %s1458_s20 = sphi %s1531_s20, %s2203_s20   ;;  %s1454_s19 = sphi %s1529_s19, %s2202_s19   ;;  %s1450_s18 = sphi %s1527_s18, %s2201_s18  }
   0xf   : > { %2173 = sst [smem:[#allocation15_spill]] %s1462_s21  ;;  %s1093_s29 = sadd.s32 4294967294, %s1486_s27  }
  0x10   : > { %2174 = sst [smem:[#allocation16_spill]] %s1466_s22  ;;  %s29_s30 = sadd.s32 1, %s1478_s25 }
  0x11   : > { %2175 = sst [smem:[#allocation17_spill]] %s1478_s25  ;;  %s32_s6 = sadd.s32 1, %s1482_s26 }
  0x12   : > { %2176 = sst [smem:[#allocation18_spill]] %s1482_s26  ;;  %p30_p0 = scmp.ge.s32.totalorder %s29_s30, 2 }
  0x13   : > { %s104_s7 = sadd.s32 1, %s1466_s22  ;;  %p111_p1 = scmp.ne.s32.totalorder %s1466_s22, %s1462_s21 }
  0x14   : > { %p112_p2 = scmp.eq.s32.totalorder %s1486_s27, 0  ;;  %s2211_s6 = smov (!%p30_p0, %s32_s6), %s1482_s26 }
  0x15   : > { %s1585_s8 = scalar_select %p30_p0, 0, %s29_s30  }
  0x16   : > { %p1595_p3 = por %p112_p2, %p111_p1  ;;  %p34_p4 = scmp.ge.s32.totalorder %s2211_s6, 2 }
  0x17   : > { %2177 = sst [smem:[#allocation19_spill]] %s1585_s8  ;;  %s100_s9 = ssub.s32 %s1478_s25, %s1585_s8 }
  0x18   : > { %s2178_s10 = scalar_select %p1595_p3, 1, 0 }
  0x19   : > { %s128_s11 = sadd.s32 1, %s1585_s8  ;;  %s134_s13 = sadd.s32 1, %s1458_s20 }
  0x1a   : > { %s130_s12 = ssub.s32 %s29_s30, %s128_s11  ;;  %s2213_s6 = smov (%p34_p4, %s2211_s6), 0 }
  0x1b   : > { %2179 = sst [smem:[#allocation20_spill]] %s2213_s6  ;;  %p141_p5 = scmp.ne.s32.totalorder %s1458_s20, %s1454_s19 }
  0x1c   : > { %p173_p6 = scmp.eq.s32.totalorder %s1092_s28, 3  ;;  %s99_s14 = ssub.s32 %s1482_s26, %s2213_s6 }
  0x1d   : > { %p178_p7 = scmp.ne.s32.totalorder %s1462_s21, %s1450_s18  ;;  %s101_s15 = sor.u32 %s100_s9, %s99_s14 }
  0x1e   : > { %s131_s16 = sor.u32 %s130_s12, %s99_s14  ;;  %p102_p8 = scmp.eq.s32.totalorder %s101_s15, 0 }
  0x1f   : > { %p132_p9 = scmp.eq.s32.totalorder %s131_s16, 0  ;;  %p1613_p10 = por %p141_p5, %p112_p2 }
  0x20   : > { %p1620_p11 = por %p173_p6, %p111_p1  ;;  %p179_p12 = scmp.eq.s32.totalorder %s1093_s29, 3 }
  0x21   : > { %s2180_s17 = scalar_select %p1613_p10, 1, 0 }
  0x22   : > { %s2181_s30 = scalar_select %p1620_p11, 1, 0 }
  0x23   : > { %s1625_s11 = scalar_select %p102_p8, %s1466_s22, %s104_s7  }
  0x24   : > { %s1628_s8 = scalar_select %p132_p9, %s1458_s20, %s134_s13  }
  0x25   : > { %2182 = sst [smem:[#allocation21_spill]] %s1625_s11  ;;  %p1094_p13 = scmp.ge.s32.totalorder %s1486_s27, 1 }
  0x26   : > { %2183 = sst [smem:[#allocation22_spill]] %s1628_s8  ;;  %p186_p0 = scmp.lt.s32.totalorder %s1486_s27, 5 }
  0x27   : > { %p1632_p4 = por %p179_p12, %p178_p7  ;;  %p1638_p2 = scmp.eq.s32.totalorder %s1092_s28, 0 }
  0x28   : > { %p1642_p1 = pnand %p1094_p13, %p186_p0  ;;  %s2188_s1 = sld [smem:[#allocation25_spill]] }
  0x29   : > { %s2184_s9 = scalar_select %p1632_p4, 1, 0 }
  0x2a   : > { %s2186_s12 = scalar_select %p1638_p2, 1, 0 }
  0x2b   : > { %2185 = sst [smem:[#allocation23_spill]] %s2184_s9  ;;  %p1214_p5 = pneg %p1642_p1 }
  0x2c   : > { %s2187_s14 = scalar_select %p1642_p1, 1, 0 }
  0x2d   : > { %p1653_p6 = pnand %p1638_p2, %p1214_p5  ;;  %s2190_s0 = sld [smem:[#allocation24_spill]] }
  0x2e   : > { %s210_s29 = sshll.u32 %s2188_s1, 4  ;;  %s211_s29 = int_to_ptr.vmem [resolvable:$true] %s210_s29 }
  0x2f   : > { %s1323_s11 = scalar_lea.vmem %s211_s29, 16  ;;  %p1325_p8 = pneg %p1653_p6 }
  0x30   : > { %p1324_p7 = scmp.ne.s32.totalorder %s211_s29, %s1323_s11  ;;  %p1331_p13 = scmp.lt.s32.totalorder %s211_s29, %s211_s29 }
  0x31   : > { %p1332_p0 = scmp.lt.s32.totalorder %s1323_s11, %s1323_s11 }
  0x32   : > { %p1326_p9 = pnand %p1325_p8, %p1324_p7 }
  0x33   : > { %s199_s6 = sshll.u32 %s2190_s0, 4  ;;  %p1333_p5 = por %p1332_p0, %p1331_p13  ;;  %s200_s6 = int_to_ptr.vmem [resolvable:$true] %s199_s6 }
  0x34   : > { %p1327_p12 = pneg %p1326_p9 }
  0x36   : > { %p1334_p4 = pnand %p1333_p5, %p1327_p12 }
  0x38   : > { %1337 = shalt.err (!%p1334_p4)
}
  0x39   : > { %s1488_s7 = smov [#allocation5]   ;;  %s1338_s13 = scalar_lea.vmem %s200_s6, 16 }
  0x3a   : > { %1220 = dma.vmem_to_smem (!%p1653_p6), %s211_s29, 16, %s1488_s7, [#allocation6]  }
  0x3b   : > { %p1339_p11 = scmp.ne.s32.totalorder %s200_s6, %s1338_s13  ;;  %p1346_p10 = scmp.lt.s32.totalorder %s200_s6, %s200_s6 }
  0x3c   : > { %p1347_p3 = scmp.lt.s32.totalorder %s1338_s13, %s1338_s13 }
  0x3d   : > { %p1341_p2 = pnand %p1339_p11, %p1325_p8 }
  0x3e   : > { %p1348_p7 = por %p1347_p3, %p1346_p10 }
  0x3f   : > { %p1342_p1 = pneg %p1341_p2 }
  0x41   : > { %p1349_p9 = pnand %p1348_p7, %p1342_p1 }
  0x43   : > { %1352 = shalt.err (!%p1349_p9)
}
  0x44   : > { %s1489_s11 = smov [#allocation2]   ;;  %s2191_s2 = sld [smem:[#allocation26_spill]] }
  0x45   : > { %1217 = dma.vmem_to_smem (!%p1653_p6), %s200_s6, 16, %s1489_s11, [#allocation4]  }
  0x4a   : > { %s221_s29 = sshll.u32 %s2191_s2, 4  ;;  %s222_s29 = int_to_ptr.vmem [resolvable:$true] %s221_s29 }
  0x4b   : > { %s1353_s7 = scalar_lea.vmem %s222_s29, 16  ;;  %p1361_p12 = scmp.lt.s32.totalorder %s222_s29, %s222_s29 }
  0x4c   : > { %p1354_p4 = scmp.ne.s32.totalorder %s222_s29, %s1353_s7  ;;  %p1362_p3 = scmp.lt.s32.totalorder %s1353_s7, %s1353_s7 }
  0x4e   : > { %p1356_p11 = pnand %p1354_p4, %p1325_p8  ;;  %p1363_p10 = por %p1362_p3, %p1361_p12 }
  0x50   : > { %p1357_p2 = pneg %p1356_p11 }
  0x52   : > { %p1364_p1 = pnand %p1363_p10, %p1357_p2 }
  0x54   : > { %1367 = shalt.err (!%p1364_p1)
}
  0x55   : > { %s1490_s13 = smov [#allocation7]   ;;  %p1098_p13 = scmp.ge.s32.totalorder %s1486_s27, 4 }
  0x56   : > { %1223 = dma.vmem_to_smem (!%p1653_p6), %s222_s29, 16, %s1490_s13, [#allocation6]  }
  0x57   : > { %228 = sbr.rel (%p1098_p13) target bundleno = 119 (0x77), region = 28  ;;  %p2192_p0 = scmp.ne.s32.totalorder (!%p1098_p13), %s2178_s10, 0 }
  0x5e   : > { %231 = sbr.rel (!%p2192_p0) target bundleno = 106 (0x6a), region = 32  ;;  %s233_s6 = sand.u32 (%p2192_p0), 1, %s1466_s22  }
  0x5f   : > { %s1199_s11 = smul.u32 (%p2192_p0), 12, %s1482_s26  ;;  %s1099_s28 = sshll.u32 (%p2192_p0), %s233_s6, 5 }
  0x60   : > { %s2193_s3 = sld [smem:[#allocation27_spill]] (%p2192_p0)  ;;  %s235_s15 = scalar_lea.vmem (%p2192_p0), [#allocation8], %s1099_s28 }
  0x61   : > { %s237_s16 = sadd.s32 (%p2192_p0), %s1478_s25, %s1199_s11 }
  0x62   : > { %s1100_s7 = sshll.u32 (%p2192_p0), %s237_s16, 3 }
  0x66   : > { %s239_s2 = scalar_lea.vmem %s2193_s3, %s1100_s7 }
  0x67   : > { %v273_v0 = vld [vmem:[%s239_s2] sm:$0xff]  ;;  %v275_v1 = vld [vmem:[%s239_s2 + $0x18] sm:$0xff]  ;;  %v277_v2 = vld [vmem:[%s239_s2 + $0x30] sm:$0xff] }
  0x68   : > { %274 = vst [vmem:[%s235_s15] sm:$0xff] %v273_v0  ;;  %276 = vst [vmem:[%s235_s15 + $0x8] sm:$0xff] %v275_v1  ;;  %v279_v3 = vld [vmem:[%s239_s2 + $0x48] sm:$0xff] }
  0x69   : > { %278 = vst [vmem:[%s235_s15 + $0x10] sm:$0xff] %v277_v2  ;;  %280 = vst [vmem:[%s235_s15 + $0x18] sm:$0xff] %v279_v3 }
  0x6a PF: > { %p2194_p6 = scmp.ne.s32.totalorder %s2180_s17, 0 }
  0x6b   : > { %s288_s10 = sand.u32 (%p2194_p6), 1, %s1458_s20   ;;  %s993_s29 = smul.u32 (%p2194_p6), 12, %s1482_s26 }
  0x6c   : > { %286 = sbr.rel (!%p2194_p6) target bundleno = 119 (0x77), region = 70  ;;  %s1101_s0 = sshll.u32 (%p2194_p6), %s288_s10, 5 }
  0x6d   : > { %s994_s1 = sadd.s32 (%p2194_p6), %s1478_s25, %s993_s29  ;;  %s2195_s4 = sld [smem:[#allocation28_spill]] (%p2194_p6) }
  0x6e   : > { %s1102_s13 = sshll.u32 (%p2194_p6), %s994_s1, 3  ;;  %s290_s2 = scalar_lea.vmem (%p2194_p6), [#allocation9], %s1101_s0 }
  0x73   : > { %s996_s28 = scalar_lea.vmem %s2195_s4, %s1102_s13 }
  0x74   : > { %v1103_v4 = vld [vmem:[%s996_s28 + $0x8] sm:$0xff]  ;;  %v1104_v5 = vld [vmem:[%s996_s28 + $0x20] sm:$0xff]  ;;  %v1105_v6 = vld [vmem:[%s996_s28 + $0x38] sm:$0xff] }
  0x75   : > { %330 = vst [vmem:[%s290_s2] sm:$0xff] %v1103_v4  ;;  %332 = vst [vmem:[%s290_s2 + $0x8] sm:$0xff] %v1104_v5  ;;  %v1106_v7 = vld [vmem:[%s996_s28 + $0x50] sm:$0xff] }
  0x76   : > { %334 = vst [vmem:[%s290_s2 + $0x10] sm:$0xff] %v1105_v6  ;;  %336 = vst [vmem:[%s290_s2 + $0x18] sm:$0xff] %v1106_v7 }
  0x77 PF: > { %p2196_p8 = scmp.ne.s32.totalorder %s2187_s14, 0 }
  0x78   : > { %p2197_p5 = scmp.ne.s32.totalorder (!%p2196_p8), %s2186_s12, 0 }
  0x79   : > { %345 = sbr.rel (%p2196_p8) target bundleno = 335 (0x14f), region = 108 }
  0x80   : > { %1437 = dma.done.wait (%p2197_p5), [#allocation4], 16  }
  0x81   : > { %1439 = vsyncadd (%p2197_p5), [#allocation4], 4294967280 }
  0x82   : > { %1441 = dma.done.wait (%p2197_p5), [#allocation6], 32  }
  0x83   : > { %1443 = vsyncadd (%p2197_p5), [#allocation6], 4294967264  ;;  %s1708_s17 = sand.u32 1, %s1462_s21   ;;  %s367_s16 = sand.u32 1, %s1454_s19  }
  0x84   : > { %s1111_s14 = sshll.u32 %s1708_s17, 5  ;;  %s1112_s7 = sshll.u32 %s367_s16, 5 }
  0x85   : > { %s362_s15 = scalar_lea.vmem [#allocation8], %s1111_s14  ;;  %s1712_s10 = scalar_lea.vmem [#allocation9], %s1112_s7 }
  0x86   : > { %373 = sfence }
  0x87   : > { %s1123_s29 = sld [smem:[#allocation2 + $0xa]]  ;;  %s1114_s0 = sld [smem:[#allocation2 + $0x1]]  ;;  %v1718_v8 = vld [vmem:[%s362_s15 + $0x8] sm:$0xff]  ;;  %v1722_v9 = vld [vmem:[%s362_s15] sm:$0xff]  ;;  %v1732_v16 = vld [vmem:[%s362_s15 + $0x18] sm:$0xff]  ;;  %vm433_vm0 = vcmask 1046528  }
  0x88   : > { %s1124_s1 = sld [smem:[#allocation2 + $0xb]]  ;;  %s1115_s13 = sld [smem:[#allocation2 + $0x2]]  ;;  %v1735_v17 = vld [vmem:[%s1712_s10] sm:$0xff]  ;;  %v1740_v20 = vld [vmem:[%s362_s15 + $0x10] sm:$0xff]  ;;  %v1750_v24 = vld [vmem:[%s1712_s10 + $0x8] sm:$0xff]  ;;  %vm471_vm1 = vcmask 1045504  }
  0x89   : > { %s1714_s6 = sld [smem:[#allocation2 + $0x1c]]  ;;  %s1716_s12 = sld [smem:[#allocation2 + $0x13]]  ;;  %v1785_v46 = vld [vmem:[%s1712_s10 + $0x10] sm:$0xff]  ;;  %v1796_v56 = vld [vmem:[%s1712_s10 + $0x18] sm:$0xff]  ;;  %vm800_vm2 = vcmask 130048  }
  0x8a   : > { %s1117_s11 = sld [smem:[#allocation2 + $0x4]]  ;;  %s1724_s19 = sld [smem:[#allocation2 + $0xd]] }
  0x8b   : > { %s1720_s28 = sld [smem:[#allocation2 + $0x14]]  ;;  %s1726_s2 = sld [smem:[#allocation2 + $0x5]] }
  0x8c   : > { %s1728_s16 = sld [smem:[#allocation2 + $0xe]]  ;;  %s1491_s14 = smov 127  }
  0x8d   : > { %v507_v10 = vstv %s1123_s29  ;;  %v412_v12 = vstv %s1114_s0  ;;  %s1743_s7 = sld [smem:[#allocation2 + $0x7]]  ;;  %s1745_s29 = sld [smem:[#allocation2 + $0x16]] }
  0x8e   : > { %v508_v11 = vmul.f32 %v507_v10, %v1718_v8  ;;  %v413_v13 = vmul.f32 %v412_v12, %v1722_v9  ;;  %v515_v14 = vstv %s1124_s1  ;;  %v420_v15 = vstv %s1115_s13  ;;  %s1756_s15 = sld [smem:[#allocation2 + $0x1d]]  ;;  %s1762_s0 = sld [smem:[#allocation2 + $0x1f]] }
  0x8f   : > { %v516_v18 = vmul.f32 %v515_v14, %v1718_v8  ;;  %v693_v19 = vstv %s1714_s6  ;;  %v600_v21 = vstv %s1716_s12  ;;  %v421_v22 = vmul.f32 %v420_v15, %v1722_v9  ;;  %s1492_s1 = smov 126   ;;  %s1767_s13 = sld [smem:[#allocation2 + $0x17]] }
  0x90   : > { %510 = vrot.lane.b32.xlu1 %v508_v11, %s1491_s14  ;;  %415 = vrot.lane.b32.xlu0 %v413_v13, %s1491_s14  ;;  %v440_v23 = vstv %s1117_s11  ;;  %v694_v25 = vmul.f32 %v693_v19, %v1732_v16  ;;  %v534_v28 = vstv %s1724_s19  ;;  %v601_v29 = vmul.f32 %v600_v21, %v1740_v20  ;;  %s1774_s6 = sld [smem:[#allocation2 + $0x10]]  ;;  %s1779_s11 = sld [smem:[#allocation2 + $0x11]] }
  0x91   : > { %v441_v26 = vmul.f32 %v440_v23, %v1722_v9  ;;  %v442_v27 = vmul.f32 %v440_v23, %v1735_v17  ;;  %v535_v30 = vmul.f32 %v534_v28, %v1718_v8  ;;  %v453_v31 = vstv %s1726_s2  ;;  %s1776_s12 = sld [smem:[#allocation2 + $0x8]]  ;;  %s1799_s19 = sld [smem:[#allocation2 + $0x19]] }
  0x92   : > { %v547_v32 = vstv %s1728_s16  ;;  %v608_v35 = vstv %s1720_s28  ;;  %v536_v36 = vmul.f32 %v534_v28, %v1750_v24  ;;  %v454_v37 = vmul.f32 %v453_v31, %v1722_v9  ;;  %s1789_s28 = sld [smem:[#allocation2 + $0x20]]  ;;  %s1805_s2 = sld [smem:[#allocation2 + $0x1a]] }
  0x93   : > { %v445_v33 = vrot.slane %v441_v26, 1  ;;  %v446_v34 = vrot.slane %v442_v27, 1  ;;  %v455_v38 = vmul.f32 %v453_v31, %v1735_v17  ;;  %v548_v39 = vmul.f32 %v547_v32, %v1718_v8  ;;  %s1817_s10 = sld [smem:[#allocation2 + $0x22]]  ;;  %s1828_s16 = sld [smem:[#allocation2 + $0x23]] }
  0x94   : > { %518 = vrot.lane.b32.xlu1 %v516_v18, %s1492_s1  ;;  %423 = vrot.lane.b32.xlu0 %v421_v22, %s1492_s1  ;;  %v549_v40 = vmul.f32 %v547_v32, %v1750_v24  ;;  %v609_v41 = vmul.f32 %v608_v35, %v1740_v20  ;;  %v539_v42 = vrot.slane %v535_v30, 1  ;;  %v540_v44 = vrot.slane %v536_v36, 1  ;;  %s1977_s3 = sld [smem:[#allocation7 + $0x7]]  ;;  %s1979_s4 = sld [smem:[#allocation5 + $0x1]] }
  0x95   : > { %v447_v43 = vsel %vm433_vm0, %v445_v33, %v446_v34  ;;  %v478_v45 = vstv %s1743_s7  ;;  %v627_v47 = vstv %s1745_s29  ;;  %v458_v48 = vrot.slane %v454_v37, 1  ;;  %s1835_s7 = sld [smem:[#allocation2 + $0x3]]  ;;  %s1840_s29 = sld [smem:[#allocation2 + $0xc]] }
  0x96   : > { %v459_v49 = vrot.slane %v455_v38, 1  ;;  %v552_v50 = vrot.slane %v548_v39, 1  ;;  %v553_v51 = vrot.slane %v549_v40, 1  ;;  %v701_v52 = vstv %s1756_s15  ;;  %s1842_s15 = sld [smem:[#allocation2 + $0x6]]  ;;  %s1981_s26 = sld [smem:[#allocation5 + $0x5]] }
  0x97   : > { %v479_v53 = vmul.f32 %v478_v45, %v1722_v9  ;;  %v480_v54 = vmul.f32 %v478_v45, %v1735_v17  ;;  %v628_v55 = vmul.f32 %v627_v47, %v1740_v20  ;;  %v720_v57 = vstv %s1762_s0  ;;  %s1845_s0 = sld [smem:[#allocation2 + $0x15]]  ;;  %s1983_s25 = sld [smem:[#allocation5 + $0x9]] }
  0x98   : > { %696 = vrot.lane.b32.xlu1 %v694_v25, %s1491_s14  ;;  %603 = vrot.lane.b32.xlu0 %v601_v29, %s1491_s14  ;;  %v541_v58 = vsel %vm433_vm0, %v539_v42, %v540_v44  ;;  %v629_v59 = vmul.f32 %v627_v47, %v1785_v46  ;;  %v640_v60 = vstv %s1767_s13  ;;  %v460_v61 = vsel %vm433_vm0, %v458_v48, %v459_v49  ;;  %s1858_s13 = sld [smem:[#allocation2 + $0x1e]]  ;;  %s1985_s22 = sld [smem:[#allocation5 + $0xd]] }
  0x99   : > { %v554_v62 = vsel %vm433_vm0, %v552_v50, %v553_v51  ;;  %v702_v63 = vmul.f32 %v701_v52, %v1732_v16  ;;  %v571_v0 = vstv %s1774_s6  ;;  %v483_v1 = vrot.slane %v479_v53, 2  ;;  %s1871_s6 = sld [smem:[#allocation2 + $0xf]]  ;;  %s1987_s8 = sld [smem:[#allocation5 + $0x11]] }
  0x9a   : > { %v721_v2 = vmul.f32 %v720_v57, %v1732_v16  ;;  %v722_v3 = vmul.f32 %v720_v57, %v1796_v56  ;;  %v491_v4 = vstv %s1776_s12  ;;  %v484_v5 = vrot.slane %v480_v54, 2  ;;  %s1137_s12 = sld [smem:[#allocation2 + $0x18]]  ;;  %s1990_s20 = sld [smem:[#allocation5 + $0x15]] }
  0x9b   : > { %v632_v6 = vrot.slane %v628_v55, 1  ;;  %v641_v7 = vmul.f32 %v640_v60, %v1740_v20  ;;  %v584_v10 = vstv %s1779_s11  ;;  %v633_v11 = vrot.slane %v629_v59, 1  ;;  %s1146_s11 = sld [smem:[#allocation2 + $0x21]]  ;;  %s1997_s9 = sld [smem:[#allocation5 + $0x1d]] }
  0x9c   : > { %448 = vrot.lane.b32.xlu1 %v447_v43, %s1491_s14  ;;  %611 = vrot.lane.b32.xlu0 %v609_v41, %s1492_s1  ;;  %v642_v12 = vmul.f32 %v640_v60, %v1785_v46  ;;  %v572_v13 = vmul.f32 %v571_v0, %v1718_v8  ;;  %v573_v14 = vmul.f32 %v571_v0, %v1750_v24  ;;  %v733_v21 = vstv %s1789_s28  ;;  %s1131_s28 = sld [smem:[#allocation2 + $0x12]]  ;;  %s1995_s21 = sld [smem:[#allocation5 + $0x19]] }
  0x9d   : > { %v492_v15 = vmul.f32 %v491_v4, %v1722_v9  ;;  %v493_v18 = vmul.f32 %v491_v4, %v1735_v17  ;;  %v585_v19 = vmul.f32 %v584_v10, %v1718_v8  ;;  %v725_v22 = vrot.slane %v721_v2, 1  ;;  %p2198_p9 = scmp.ne.s32.totalorder %s2181_s30, 0 }
  0x9e   : > { %v586_v23 = vmul.f32 %v584_v10, %v1750_v24  ;;  %v734_v25 = vmul.f32 %v733_v21, %v1732_v16  ;;  %v735_v26 = vmul.f32 %v733_v21, %v1796_v56  ;;  %v485_v27 = vsel %vm471_vm1, %v483_v1, %v484_v5 }
  0x9f   : > { %v726_v28 = vrot.slane %v722_v3, 1  ;;  %v645_v29 = vrot.slane %v641_v7, 1  ;;  %v664_v30 = vstv %s1799_s19  ;;  %v634_v31 = vsel %vm433_vm0, %v632_v6, %v633_v11  ;;  %s1140_s19 = sld [smem:[#allocation2 + $0x1b]] }
  0xa0   : > { %542 = vrot.lane.b32.xlu1 %v541_v58, %s1491_s14  ;;  %461 = vrot.lane.b32.xlu0 %v460_v61, %s1492_s1  ;;  %v646_v32 = vrot.slane %v642_v12, 1  ;;  %v576_v33 = vrot.slane %v572_v13, 2  ;;  %v677_v34 = vstv %s1805_s2  ;;  %v577_v35 = vrot.slane %v573_v14, 2  ;;  %s1942_s2 = sld [smem:[#allocation5]] }
  0xa1   : > { %v496_v36 = vrot.slane %v492_v15, 2  ;;  %v497_v37 = vrot.slane %v493_v18, 2  ;;  %v589_v38 = vrot.slane %v585_v19, 2  ;;  %v590_v39 = vrot.slane %v586_v23, 2 }
  0xa2   : > { %v738_v40 = vrot.slane %v734_v25, 1  ;;  %v739_v41 = vrot.slane %v735_v26, 1  ;;  %v1848_v42 = vmul.f32 %v664_v30, %v1740_v20  ;;  %v1851_v43 = vmul.f32 %v664_v30, %v1785_v46 }
  0xa3   : > { %v678_v44 = vmul.f32 %v677_v34, %v1740_v20  ;;  %v757_v45 = vstv %s1817_s10  ;;  %v727_v47 = vsel %vm433_vm0, %v725_v22, %v726_v28  ;;  %v679_v48 = vmul.f32 %v677_v34, %v1785_v46  ;;  %s1944_s10 = sld [smem:[#allocation5 + $0x4]] }
  0xa4   : > { %555 = vrot.lane.b32.xlu1 %v554_v62, %s1492_s1  ;;  %704 = vrot.lane.b32.xlu0 %v702_v63, %s1492_s1  ;;  %v647_v49 = vsel %vm433_vm0, %v645_v29, %v646_v32  ;;  %v578_v50 = vsel %vm471_vm1, %v576_v33, %v577_v35  ;;  %v498_v51 = vsel %vm471_vm1, %v496_v36, %v497_v37  ;;  %v770_v52 = vstv %s1828_s16  ;;  %s1946_s16 = sld [smem:[#allocation5 + $0x8]] }
  0xa5   : > { %v591_v53 = vsel %vm471_vm1, %v589_v38, %v590_v39  ;;  %v740_v54 = vsel %vm433_vm0, %v738_v40, %v739_v41  ;;  %v669_v55 = vrot.slane %v1848_v42, 2  ;;  %v1869_v57 = vmul.f32 %v757_v45, %v1732_v16 }
  0xa6   : > { %v670_v58 = vrot.slane %v1851_v43, 2  ;;  %v682_v59 = vrot.slane %v678_v44, 2  ;;  %v759_v60 = vmul.f32 %v757_v45, %v1796_v56  ;;  %v428_v61 = vstv %s1835_s7  ;;  %s1948_s7 = sld [smem:[#allocation7]] }
  0xa7   : > { %v683_v62 = vrot.slane %v679_v48, 2  ;;  %v771_v63 = vmul.f32 %v770_v52, %v1732_v16  ;;  %v772_v0 = vmul.f32 %v770_v52, %v1796_v56  ;;  %v430_v1 = vmul.f32 %v428_v61, %v1735_v17 }
  0xa8   : > { %486 = vrot.lane.b32.xlu1 %v485_v27, %s1491_s14  ;;  %635 = vrot.lane.b32.xlu0 %v634_v31, %s1491_s14  ;;  %v429_v2 = vmul.f32 %v428_v61, %v1722_v9  ;;  %v523_v3 = vstv %s1840_s29  ;;  %v466_v4 = vstv %s1842_s15  ;;  %v671_v42 = vsel %vm471_vm1, %v669_v55, %v670_v58  ;;  %s1950_s29 = sld [smem:[#allocation5 + $0xc]]  ;;  %s1953_s15 = sld [smem:[#allocation7 + $0x1]] }
  0xa9   : > { %v616_v5 = vstv %s1845_s0  ;;  %v435_v6 = vrot.slane %v430_v1, 1  ;;  %v524_v7 = vmul.f32 %v523_v3, %v1718_v8  ;;  %v525_v10 = vmul.f32 %v523_v3, %v1750_v24  ;;  %s1955_s0 = sld [smem:[#allocation7 + $0x2]] }
  0xaa   : > { %v467_v11 = vmul.f32 %v466_v4, %v1722_v9  ;;  %v434_v12 = vrot.slane %v429_v2, 1  ;;  %v468_v13 = vmul.f32 %v466_v4, %v1735_v17  ;;  %v617_v14 = vmul.f32 %v616_v5, %v1740_v20 }
  0xab   : > { %v618_v15 = vmul.f32 %v616_v5, %v1785_v46  ;;  %v528_v18 = vrot.slane %v524_v7, 1  ;;  %v529_v19 = vrot.slane %v525_v10, 1  ;;  %v709_v22 = vstv %s1858_s13  ;;  %s1957_s13 = sld [smem:[#allocation7 + $0x3]] }
  0xac   : > { %728 = vrot.lane.b32.xlu1 %v727_v47, %s1491_s14  ;;  %648 = vrot.lane.b32.xlu0 %v647_v49, %s1492_s1  ;;  %v472_v21 = vrot.slane %v467_v11, 2  ;;  %v1895_v23 = vsel %vm433_vm0, %v434_v12, %v435_v6  ;;  %v473_v25 = vrot.slane %v468_v13, 2  ;;  %v621_v26 = vrot.slane %v617_v14, 1 }
  0xad   : > { %v622_v27 = vrot.slane %v618_v15, 1  ;;  %v530_v17 = vsel %vm433_vm0, %v528_v18, %v529_v19  ;;  %v710_v28 = vmul.f32 %v709_v22, %v1732_v16  ;;  %v711_v29 = vmul.f32 %v709_v22, %v1796_v56 }
  0xae   : > { %v560_v30 = vstv %s1871_s6  ;;  %v1902_v31 = vsel %vm471_vm1, %v472_v21, %v473_v25  ;;  %v684_v35 = vsel %vm471_vm1, %v682_v59, %v683_v62  ;;  %v775_v38 = vrot.slane %v771_v63, 2  ;;  %s1959_s6 = sld [smem:[#allocation5 + $0x10]] }
  0xaf   : > { %v1905_v32 = vsel %vm433_vm0, %v621_v26, %v622_v27  ;;  %v561_v33 = vmul.f32 %v560_v30, %v1718_v8  ;;  %v562_v34 = vmul.f32 %v560_v30, %v1750_v24  ;;  %v714_v36 = vrot.slane %v710_v28, 1 }
  0xb0   : > { %579 = vrot.lane.b32.xlu1 %v578_v50, %s1491_s14  ;;  %499 = vrot.lane.b32.xlu0 %v498_v51, %s1492_s1  ;;  %v715_v37 = vrot.slane %v711_v29, 1  ;;  %v776_v39 = vrot.slane %v772_v0, 2  ;;  %v762_v43 = vrot.slane %v1869_v57, 2  ;;  %v763_v44 = vrot.slane %v759_v60, 2 }
  0xb1   : > { %v565_v40 = vrot.slane %v561_v33, 2  ;;  %v566_v41 = vrot.slane %v562_v34, 2  ;;  %v653_v49 = vstv %s1137_s12  ;;  %v597_v7 = vstv %s1131_s28  ;;  %s1961_s12 = sld [smem:[#allocation7 + $0x4]]  ;;  %s1973_s28 = sld [smem:[#allocation7 + $0x6]] }
  0xb2   : > { %v1915_v24 = vsel %vm433_vm0, %v714_v36, %v715_v37  ;;  %v777_v47 = vsel %vm471_vm1, %v775_v38, %v776_v39  ;;  %v764_v48 = vsel %vm471_vm1, %v762_v43, %v763_v44  ;;  %v654_v50 = vmul.f32 %v653_v49, %v1740_v20 }
  0xb3   : > { %v1918_v45 = vsel %vm471_vm1, %v565_v40, %v566_v41  ;;  %v655_v51 = vmul.f32 %v653_v49, %v1785_v46  ;;  %v598_v13 = vmul.f32 %v597_v7, %v1740_v20  ;;  %v690_v19 = vstv %s1140_s19  ;;  %s1975_s19 = sld [smem:[#allocation5 + $0x1c]] }
  0xb4   : > { %592 = vrot.lane.b32.xlu1 %v591_v53, %s1492_s1  ;;  %741 = vrot.lane.b32.xlu0 %v740_v54, %s1492_s1  ;;  %v658_v52 = vrot.slane %v654_v50, 2  ;;  %v746_v54 = vstv %s1146_s11  ;;  %v691_v22 = vmul.f32 %v690_v19, %v1732_v16  ;;  %s1963_s11 = sld [smem:[#allocation5 + $0x14]]  ;;  %v783_v40 = vstv %s1942_s2  ;;  %s2003_s2 = sld [smem:[#allocation5 + $0x2]] }
  0xb5   : > { %v659_v53 = vrot.slane %v655_v51, 2  ;;  %v747_v55 = vmul.f32 %v746_v54, %v1732_v16  ;;  %v748_v57 = vmul.f32 %v746_v54, %v1796_v56  ;;  %v803_v43 = vstv %s1944_s10  ;;  %s2021_s10 = sld [smem:[#allocation5 + $0x6]] }
  0xb6   : > { %v806_v44 = vstv %s1953_s15  ;;  %v863_v51 = vstv %s1959_s6  ;;  %v929_v19 = vstv %s1997_s9  ;;  %s2046_s9 = sld [smem:[#allocation5 + $0xf]]  ;;  %s2056_s15 = sld [smem:[#allocation5 + $0x1b]] }
  0xb7   : > { %v1931_v58 = vsel %vm471_vm1, %v658_v52, %v659_v53  ;;  %v751_v59 = vrot.slane %v747_v55, 2  ;;  %v752_v60 = vrot.slane %v748_v57, 2  ;;  %v866_v52 = vstv %s1961_s12  ;;  %s1113_s6 = sshll.u32 %s1708_s17, 6 }
  0xb8   : > { %685 = vrot.lane.b32.xlu1 %v684_v35, %s1492_s1  ;;  %672 = vrot.lane.b32.xlu0 %v671_v42, %s1491_s14  ;;  %v786_v42 = vstv %s1948_s7  ;;  %s2048_s7 = sld [smem:[#allocation5 + $0x13]] }
  0xb9   : > { %v1934_v61 = vsel %vm471_vm1, %v751_v59, %v752_v60  ;;  %v906_v59 = vstv %s1973_s28 }
  0xba   : > { %v883_v54 = vstv %s1963_s11  ;;  %s398_s11 = scalar_lea.vmem [#allocation10], %s1113_s6 }
  0xbc   : > { %778 = vrot.lane.b32.xlu1 %v777_v47, %s1492_s1  ;;  %765 = vrot.lane.b32.xlu0 %v764_v48, %s1491_s14  ;;  %s1122_s14 = sld [smem:[#allocation2 + $0x9]]  ;;  %s408_s1 = sld [smem:[#allocation2]]  ;;  %v843_v47 = vstv %s1950_s29  ;;  %v846_v48 = vstv %s1957_s13 }
  0xbd   : > { %s2050_s29 = sld [smem:[#allocation5 + $0x17]]  ;;  %s1195_s13 = sshll.u32 %s1474_s24, 4 }
  0xbe   : > { %s954_s12 = sadd.s32 %s1470_s23, %s1195_s13 }
  0xbf   : > { %s1196_s24 = sshll.u32 %s954_s12, 7 }
  0xc0   : > { %s2079_s28 = scalar_lea.hbm %s2154_s5, %s1196_s24 }
  0xc2   : > { %v504_v62 = vstv %s1122_s14  ;;  %v409_v63 = vstv %s408_s1  ;;  %s1966_s14 = sld [smem:[#allocation7 + $0x5]]  ;;  %s1968_s1 = sld [smem:[#allocation5 + $0x18]] }
  0xc3   : > { %v505_v46 = vmul.f32 %v504_v62, %v1718_v8  ;;  %v410_v1 = vmul.f32 %v409_v63, %v1722_v9  ;;  %v923_v62 = vstv %s1975_s19  ;;  %s943_s19 = scalar_lea.sflag [#allocation3], %s1708_s17 }
  0xc8   : > { %v886_v55 = vstv %s1966_s14  ;;  %v903_v57 = vstv %s1968_s1  ;;  %s957_s14 = sshll.u32 %s398_s11, 4  ;;  %s2081_s14 = int_to_ptr.vmem [resolvable:$true] %s957_s14 }
 0x102   : > { %v511_v0 = vpop.permute.xlu1 %510  ;;  %v416_v56 = vpop.permute.xlu0 %415 }
 0x103   : > { %v513_v2 = vadd.f32 %v511_v0, %v505_v46  ;;  %v418_v3 = vadd.f32 %v416_v56, %v410_v1  ;;  %v926_v46 = vstv %s1977_s3  ;;  %v789_v0 = vstv %s1979_s4  ;;  %s2025_s3 = sld [smem:[#allocation5 + $0xe]]  ;;  %s2027_s4 = sld [smem:[#allocation5 + $0x12]] }
 0x104   : > { %v809_v1 = vstv %s1981_s26  ;;  %v849_v56 = vstv %s1985_s22  ;;  %s2032_s22 = sld [smem:[#allocation5 + $0x16]] }
 0x105   : > { %s2038_s26 = sld [smem:[#allocation5 + $0x1e]] }
 0x106   : > { %v519_v4 = vpop.permute.xlu1 %518  ;;  %v424_v6 = vpop.permute.xlu0 %423 }
 0x107   : > { %v521_v5 = vadd.f32 %v519_v4, %v513_v2  ;;  %v426_v10 = vadd.f32 %v424_v6, %v418_v3  ;;  %v829_v2 = vstv %s1983_s25  ;;  %v869_v3 = vstv %s1987_s8  ;;  %s2034_s25 = sld [smem:[#allocation5 + $0x1a]]  ;;  %s2040_s8 = sld [smem:[#allocation5 + $0x3]] }
 0x109   : > { %v532_v11 = vadd.f32 %v530_v17, %v521_v5  ;;  %v438_v8 = vadd.f32 %v1895_v23, %v426_v10 }
 0x10a   : > { %v697_v12 = vpop.permute.xlu1 %696  ;;  %v604_v14 = vpop.permute.xlu0 %603 }
 0x10b   : > { %v606_v15 = vadd.f32 %v604_v14, %v598_v13  ;;  %v699_v23 = vadd.f32 %v697_v12, %v691_v22 }
 0x10e   : > { %v449_v18 = vpop.permute.xlu1 %448  ;;  %v612_v9 = vpop.permute.xlu0 %611 }
 0x10f   : > { %v614_v21 = vadd.f32 %v612_v9, %v606_v15  ;;  %v451_v25 = vadd.f32 %v449_v18, %v438_v8  ;;  %v889_v15 = vstv %s1990_s20  ;;  %v909_v18 = vstv %s1995_s21  ;;  %s2042_s20 = sld [smem:[#allocation5 + $0x7]]  ;;  %s2044_s21 = sld [smem:[#allocation5 + $0xb]] }
 0x111   : > { %v625_v27 = vadd.f32 %v1905_v32, %v614_v21 }
 0x112   : > { %v543_v26 = vpop.permute.xlu1 %542  ;;  %v462_v28 = vpop.permute.xlu0 %461 }
 0x113   : > { %v464_v17 = vadd.f32 %v462_v28, %v451_v25  ;;  %v545_v20 = vadd.f32 %v543_v26, %v532_v11  ;;  %v793_v25 = vstv %s2003_s2  ;;  %s1368_s2 = scalar_lea.vmem %s2081_s14, 1024 }
 0x114   : > { %p1369_p7 = scmp.ne.s32.totalorder %s2081_s14, %s1368_s2 }
 0x115   : > { %v476_v16 = vadd.f32 %v1902_v31, %v464_v17 }
 0x116   : > { %v556_v29 = vpop.permute.xlu1 %555  ;;  %v705_v32 = vpop.permute.xlu0 %704  ;;  %p1370_p4 = pnand %p1369_p7, %p2198_p9 }
 0x117   : > { %v558_v30 = vadd.f32 %v556_v29, %v545_v20  ;;  %v707_v33 = vadd.f32 %v705_v32, %v699_v23 }
 0x118   : > { %p1371_p11 = pneg %p1370_p4 }
 0x119   : > { %v569_v34 = vadd.f32 %v1918_v45, %v558_v30  ;;  %v1971_v35 = vadd.f32 %v1915_v24, %v707_v33  ;;  %v823_v24 = vstv %s1946_s16  ;;  %v826_v45 = vstv %s1955_s0  ;;  %s2023_s16 = sld [smem:[#allocation5 + $0xa]]  ;;  %s2058_s0 = sld [smem:[#allocation5 + $0x1f]] }
 0x11a   : > { %v487_v31 = vpop.permute.xlu1 %486  ;;  %v636_v36 = vpop.permute.xlu0 %635 }
 0x11b   : > { %v638_v37 = vadd.f32 %v636_v36, %v625_v27  ;;  %v489_v49 = vadd.f32 %v487_v31, %v476_v16 }
 0x11e   : > { %v729_v38 = vpop.permute.xlu1 %728  ;;  %v649_v39 = vpop.permute.xlu0 %648 }
 0x11f   : > { %v651_v41 = vadd.f32 %v649_v39, %v638_v37  ;;  %v731_v9 = vadd.f32 %v729_v38, %v1971_v35 }
 0x121   : > { %v2008_v53 = vadd.f32 %v1931_v58, %v651_v41 }
 0x122   : > { %v580_v50 = vpop.permute.xlu1 %579  ;;  %v500_v60 = vpop.permute.xlu0 %499 }
 0x123   : > { %v502_v63 = vadd.f32 %v500_v60, %v489_v49  ;;  %v582_v14 = vadd.f32 %v580_v50, %v569_v34  ;;  %v813_v49 = vstv %s2021_s10  ;;  %v833_v50 = vstv %s2023_s16  ;;  %s1493_s10 = smov [#allocation10]  }
 0x124   : > { %v933_v60 = vstv %s2038_s26  ;;  %s1372_s16 = sshll.u32 %s1493_s10, 4  ;;  %s1373_s16 = int_to_ptr.vmem [resolvable:$false] %s1372_s16 }
 0x125   : > { %v784_v4 = vmul.f32 %v783_v40, %v502_v63  ;;  %v804_v5 = vmul.f32 %v803_v43, %v502_v63  ;;  %v824_v58 = vmul.f32 %v823_v24, %v502_v63  ;;  %v844_v6 = vmul.f32 %v843_v47, %v502_v63  ;;  %p1375_p2 = scmp.lt.s32.totalorder %s2081_s14, %s1373_s16 }
 0x126   : > { %v864_v7 = vmul.f32 %v863_v51, %v502_v63  ;;  %v884_v10 = vmul.f32 %v883_v54, %v502_v63  ;;  %v904_v11 = vmul.f32 %v903_v57, %v502_v63  ;;  %v924_v12 = vmul.f32 %v923_v62, %v502_v63  ;;  %v593_v13 = vpop.permute.xlu1 %592  ;;  %v742_v8 = vpop.permute.xlu0 %741 }
 0x127   : > { %v787_v21 = vadd.f32 %v786_v42, %v784_v4  ;;  %v807_v22 = vadd.f32 %v806_v44, %v804_v5  ;;  %v827_v26 = vadd.f32 %v826_v45, %v824_v58  ;;  %v847_v27 = vadd.f32 %v846_v48, %v844_v6 }
 0x128   : > { %v867_v28 = vadd.f32 %v866_v52, %v864_v7  ;;  %v595_v17 = vadd.f32 %v593_v13, %v582_v14  ;;  %v887_v20 = vadd.f32 %v886_v55, %v884_v10  ;;  %v907_v23 = vadd.f32 %v906_v59, %v904_v11 }
 0x129   : > { %v927_v29 = vadd.f32 %v926_v46, %v924_v12  ;;  %v744_v16 = vadd.f32 %v742_v8, %v731_v9  ;;  %v853_v54 = vstv %s2025_s3  ;;  %v873_v55 = vstv %s2027_s4  ;;  %s1374_s3 = scalar_lea.vmem %s1373_s16, 2048 }
 0x12a   : > { %v673_v30 = vpop.permute.xlu0 %672  ;;  %v790_v32 = vmul.f32 %v789_v0, %v595_v17  ;;  %v810_v33 = vmul.f32 %v809_v1, %v595_v17  ;;  %v830_v34 = vmul.f32 %v829_v2, %v595_v17  ;;  %v850_v31 = vmul.f32 %v849_v56, %v595_v17  ;;  %v686_v47 = vpop.permute.xlu1 %685  ;;  %p1376_p12 = scmp.lt.s32.totalorder %s1374_s3, %s1368_s2 }
 0x12b   : > { %v870_v35 = vmul.f32 %v869_v3, %v595_v17  ;;  %v890_v36 = vmul.f32 %v889_v15, %v595_v17  ;;  %v910_v37 = vmul.f32 %v909_v18, %v595_v17  ;;  %v930_v38 = vmul.f32 %v929_v19, %v595_v17 }
 0x12c   : > { %v791_v39 = vadd.f32 %v790_v32, %v787_v21  ;;  %v811_v40 = vadd.f32 %v810_v33, %v807_v22  ;;  %v831_v41 = vadd.f32 %v830_v34, %v827_v26  ;;  %v851_v42 = vadd.f32 %v850_v31, %v847_v27  ;;  %p1377_p3 = por %p1376_p12, %p1375_p2 }
 0x12d   : > { %v871_v43 = vadd.f32 %v870_v35, %v867_v28  ;;  %v891_v44 = vadd.f32 %v890_v36, %v887_v20  ;;  %v911_v24 = vadd.f32 %v910_v37, %v907_v23  ;;  %v931_v45 = vadd.f32 %v930_v38, %v927_v29 }
 0x12e   : > { %v675_v48 = vadd.f32 %v673_v30, %v2008_v53  ;;  %v755_v51 = vadd.f32 %v1934_v61, %v744_v16  ;;  %v766_v52 = vpop.permute.xlu0 %765  ;;  %v893_v57 = vstv %s2032_s22  ;;  %v913_v59 = vstv %s2034_s25  ;;  %v779_v10 = vpop.permute.xlu1 %778  ;;  %p1378_p10 = pnand %p1377_p3, %p1371_p11 }
 0x12f   : > { %v797_v53 = vstv %s2040_s8  ;;  %v817_v46 = vstv %s2042_s20  ;;  %v837_v0 = vstv %s2044_s21  ;;  %v857_v61 = vstv %s2046_s9 }
 0x130   : > { %v688_v62 = vadd.f32 %v686_v47, %v675_v48  ;;  %v768_v63 = vadd.f32 %v766_v52, %v755_v51  ;;  %v877_v1 = vstv %s2048_s7  ;;  %v897_v9 = vstv %s2050_s29 }
 0x131   : > { %v917_v21 = vstv %s2056_s15  ;;  %v937_v22 = vstv %s2058_s0 }
 0x132   : > { %v794_v2 = vmul.f32 %v793_v25, %v688_v62  ;;  %v814_v56 = vmul.f32 %v813_v49, %v688_v62  ;;  %v834_v3 = vmul.f32 %v833_v50, %v688_v62  ;;  %v854_v4 = vmul.f32 %v853_v54, %v688_v62 }
 0x133   : > { %v874_v5 = vmul.f32 %v873_v55, %v688_v62  ;;  %v894_v58 = vmul.f32 %v893_v57, %v688_v62  ;;  %v914_v6 = vmul.f32 %v913_v59, %v688_v62  ;;  %v934_v7 = vmul.f32 %v933_v60, %v688_v62 }
 0x134   : > { %v795_v11 = vadd.f32 %v794_v2, %v791_v39  ;;  %v815_v12 = vadd.f32 %v814_v56, %v811_v40  ;;  %v835_v13 = vadd.f32 %v834_v3, %v831_v41  ;;  %v855_v8 = vadd.f32 %v854_v4, %v851_v42 }
 0x135   : > { %v875_v14 = vadd.f32 %v874_v5, %v871_v43  ;;  %v895_v15 = vadd.f32 %v894_v58, %v891_v44  ;;  %v915_v18 = vadd.f32 %v914_v6, %v911_v24  ;;  %v935_v19 = vadd.f32 %v934_v7, %v931_v45 }
 0x136   : > { %v781_v25 = vadd.f32 %v779_v10, %v768_v63 }
 0x138   : > { %v798_v26 = vmul.f32 %v797_v53, %v781_v25  ;;  %v818_v27 = vmul.f32 %v817_v46, %v781_v25  ;;  %v838_v28 = vmul.f32 %v837_v0, %v781_v25  ;;  %v858_v17 = vmul.f32 %v857_v61, %v781_v25 }
 0x139   : > { %v878_v20 = vmul.f32 %v877_v1, %v781_v25  ;;  %v898_v23 = vmul.f32 %v897_v9, %v781_v25  ;;  %v918_v29 = vmul.f32 %v917_v21, %v781_v25  ;;  %v938_v16 = vmul.f32 %v937_v22, %v781_v25 }
 0x13a   : > { %v799_v30 = vadd.f32 %v798_v26, %v795_v11  ;;  %v819_v32 = vadd.f32 %v818_v27, %v815_v12  ;;  %v839_v33 = vadd.f32 %v838_v28, %v835_v13  ;;  %v859_v34 = vadd.f32 %v858_v17, %v855_v8 }
 0x13b   : > { %v879_v31 = vadd.f32 %v878_v20, %v875_v14  ;;  %v899_v35 = vadd.f32 %v898_v23, %v895_v15  ;;  %v919_v36 = vadd.f32 %v918_v29, %v915_v18  ;;  %v939_v37 = vadd.f32 %v938_v16, %v935_v19 }
 0x13c   : > { %801 = vst.msk [vmem:[%s398_s11] sm:$0xff] %vm800_vm2, %v799_v30  ;;  %1157 = vst.msk [vmem:[%s398_s11 + $0x8] sm:$0xff] %vm800_vm2, %v819_v32 }
 0x13d   : > { %1163 = vst.msk [vmem:[%s398_s11 + $0x10] sm:$0xff] %vm800_vm2, %v839_v33  ;;  %1169 = vst.msk [vmem:[%s398_s11 + $0x18] sm:$0xff] %vm800_vm2, %v859_v34 }
 0x13e   : > { %1175 = vst.msk [vmem:[%s398_s11 + $0x20] sm:$0xff] %vm800_vm2, %v879_v31  ;;  %1181 = vst.msk [vmem:[%s398_s11 + $0x28] sm:$0xff] %vm800_vm2, %v899_v35 }
 0x13f   : > { %1187 = vst.msk [vmem:[%s398_s11 + $0x30] sm:$0xff] %vm800_vm2, %v919_v36  ;;  %1193 = vst.msk [vmem:[%s398_s11 + $0x38] sm:$0xff] %vm800_vm2, %v939_v37 }
 0x140   : > { %1381 = shalt.err (!%p1378_p10)
}
 0x141   : > { %s1382_s4 = scalar_lea.hbm %s2079_s28, 1024  ;;  %s1386_s26 = scalar_lea.hbm %s2154_s5, 4096 }
 0x142   : > { %p1383_p1 = scmp.ne.s32.totalorder %s2079_s28, %s1382_s4  ;;  %p1387_p6 = scmp.lt.u32.totalorder %s2079_s28, %s2154_s5 }
 0x143   : > { %p1388_p8 = scmp.lt.u32.totalorder %s1386_s26, %s1382_s4  ;;  %p1390_p7 = scmp.lt.u32.totalorder %s1382_s4, %s2079_s28 }
 0x144   : > { %p1384_p13 = pnand %p1383_p1, %p2198_p9 }
 0x145   : > { %p1389_p5 = por %p1388_p8, %p1387_p6 }
 0x146   : > { %p1385_p0 = pneg %p1384_p13 }
 0x147   : > { %p1391_p4 = por %p1390_p7, %p1389_p5 }
 0x149   : > { %p1392_p11 = pnand %p1391_p4, %p1385_p0 }
 0x14b   : > { %1395 = shalt.err (!%p1392_p11)
}
 0x14c   : > { %s1494_s21 = smov 128   ;;  %s1495_s9 = smov 256  }
 0x14d   : > { %s1496_s7 = smov 8  }
 0x14e   : > { %1212 = dma.vmem_to_hbm [thread:$0]  (%p2198_p9), %s2081_s14, 1024, %s2079_s28, %s943_s19, %s1494_s21, %s1495_s9, %s1496_s7  }
 0x14f PF: > { %s2199_s29 = sld [smem:[#allocation23_spill]]  ;;  %p1234_p2 = scmp.ge.s32.totalorder %s1486_s27, 2 }
 0x150   : > { %s972_s15 = sand.u32 1, %s1450_s18  }
 0x151   : > { %s973_s0 = scalar_lea.sflag [#allocation3], %s972_s15 }
 0x155   : > { %p2200_p12 = scmp.ne.s32.totalorder %s2199_s29, 0 }
 0x157   : > { %p1225_p3 = pnand %p1234_p2, %p2200_p12 }
 0x159   : > { %1445 = dma.done.wait (!%p1225_p3), %s973_s0, 1024  }
 0x15a   : > { %1447 = vsyncadd (!%p1225_p3), %s973_s0, 4294966272  ;;  %s20_s27 = sadd.s32 1, %s1486_s27   ;;  %s2201_s18 = sld [smem:[#allocation15_spill]] }
 0x15b   : > { %p17_p10 = scmp.ge.s32.totalorder %s20_s27, 6   ;;  %s2202_s19 = sld [smem:[#allocation14_spill]] }
 0x15c   : > { %s2203_s20 = sld [smem:[#allocation22_spill]]  ;;  %s2204_s21 = sld [smem:[#allocation16_spill]] }
 0x15d   : > { %s2205_s22 = sld [smem:[#allocation21_spill]]  ;;  %s2206_s23 = sld [smem:[#allocation17_spill]] }
 0x15e   : > { %s2207_s24 = sld [smem:[#allocation18_spill]]  ;;  %s2208_s25 = sld [smem:[#allocation19_spill]] }
 0x15f   : > { %s2209_s26 = sld [smem:[#allocation20_spill]]  ;;  %19 = sbr.rel (!%p17_p10) target bundleno = 14 (0xe), region = 184 }
 0x166   :  { %978 = vsyncpa [#allocation3], 1 }
 0x167   :  { %980 = vsyncpa [#allocation3 + $0x1], 1 }
 0x168   :  { %981 = vsyncpa [#allocation4], 1 }
 0x169   :  { %983 = vsyncpa [#allocation4 + $0x1], 1 }
 0x16a   :  { %984 = vsyncpa [#allocation6], 1 }

</bundles_post_ra>
